<compile_context>
chip_gen: v6e
topology: v6e:2x2x1
jax: 0.10.0
libtpu: 0.0.40
codegen_flags: <defaults>
</compile_context>

<pallas_src>
import math

import jax
import jax.numpy as jnp
import numpy as np
from jax.experimental import pallas as pl
from jax.experimental.pallas import tpu as pltpu

LEAK = 0.2                      # nflib MLP uses LeakyReLU(0.2)
_LOG_2PI = math.log(2.0 * math.pi)


def _leaky(h):
    return jnp.where(h > 0, h, LEAK * h)


# -----------------------------------------------------------------------------
# Fused kernel: all flows + log_det accumulation + base log_prob, one invocation
# per batch tile.  Batch-on-lanes: every matmul is W^T (out,in) @ x (in, TB).
# -----------------------------------------------------------------------------
def _fused_flow_kernel(x_ref, pT_ref,
                       w1_ref, b1_ref, w2_ref, b2_ref, w3_ref, b3_ref,
                       w4s_ref, b4s_ref, w4t_ref, b4t_ref,
                       zs_ref, stats_ref):
    xT = x_ref[...]                                  # (D, TB) f32, batch on lanes
    d, tb = xT.shape
    num_flows = w1_ref.shape[0]
    cdt = w1_ref.dtype                               # matmul operand dtype (bf16)
    pT = pT_ref[...]                                 # (D, D) f32 de-interleave, hoisted

    zs_ref[0] = xT
    ld = jnp.zeros((1, tb), jnp.float32)             # running log_det, batch on lanes

    for k in range(num_flows):                       # static unroll (num_flows is tiny)
        # De-interleaved state for the elementwise affine (kept f32 so the pass-through
        # half is carried exactly).
        # TODO(synk): at large D fold P^{-k} into the per-flow weights / use an XLU
        # de-interleave instead of this per-flow (D,D) MXU matmul — at D=8 it is noise.
        xpT = jnp.dot(pT, xT, preferred_element_type=jnp.float32)

        # Merged s|t conditioner MLP; even/odd column selection + parity folded into w1,
        # so the conditioner reads raw x and the body is identical for every flow.
        h = _leaky(jnp.dot(w1_ref[k], xT.astype(cdt),
                           preferred_element_type=jnp.float32) + b1_ref[k])
        h = _leaky(jnp.dot(w2_ref[k], h.astype(cdt),
                           preferred_element_type=jnp.float32) + b2_ref[k])
        h = _leaky(jnp.dot(w3_ref[k], h.astype(cdt),
                           preferred_element_type=jnp.float32) + b3_ref[k])
        hb = h.astype(cdt)
        s = jnp.dot(w4s_ref[k], hb, preferred_element_type=jnp.float32) + b4s_ref[k]
        t = jnp.dot(w4t_ref[k], hb, preferred_element_type=jnp.float32) + b4t_ref[k]

        # s/t are exactly zero on the pass-through rows -> exp(0)*x + 0 is the identity.
        xT = jnp.exp(s) * xpT + t
        ld = ld + jnp.sum(s, axis=0, keepdims=True)  # XLU row-reduce, (1, TB)
        zs_ref[k + 1] = xT                           # lane-dense (D, TB) store

    lp = -0.5 * d * _LOG_2PI - 0.5 * jnp.sum(xT * xT, axis=0, keepdims=True)
    stats_ref[...] = jnp.concatenate([ld, lp], axis=0)   # one merged (2, TB) store


def _pick_tile(B):
    # Larger tiles amortize the ~0.35us/step overhead (v5e/v6e have 128 MiB VMEM) while
    # keeping >=2 grid steps so v7x can shard across both TensorCores.
    for cand in (1024, 512, 256, 128):
        if B > cand and B % cand == 0:
            return cand
    return B   # TODO(synk): cdiv + pad the last tile for large B not divisible by 128.


def fused_forward_T(xT, packed):
    """xT is (D, B) (batch on lanes).  Returns (zsT (F+1, D, B), stats (2, B))."""
    D, B = xT.shape
    F = packed["w1"].shape[0]
    TB = _pick_tile(B)
    grid = (B // TB,)

    def const_spec(a):
        n = a.ndim
        return pl.BlockSpec(a.shape, lambda i, _n=n: (0,) * _n)

    const_names = ("PT", "w1", "b1", "w2", "b2", "w3", "b3",
                   "w4s", "b4s", "w4t", "b4t")
    consts = [packed[k] for k in const_names]

    # VMEM budget (double-buffered consts + x/zs/stats blocks): raise the scoped limit
    # only when a large tile actually needs it (v7x scoped default is 32 MiB).
    const_bytes = sum(int(np.prod(a.shape)) * a.dtype.itemsize for a in consts)
    block_bytes = 4 * (D * TB + (F + 1) * D * TB + 2 * TB)
    vmem_est = 2 * (const_bytes + block_bytes)
    cp_kwargs = dict(dimension_semantics=("parallel",))
    if vmem_est > 24 * 1024 * 1024:
        cp_kwargs["vmem_limit_bytes"] = min(int(vmem_est * 5 // 4), 64 * 1024 * 1024)

    zsT, stats = pl.pallas_call(
        _fused_flow_kernel,
        grid=grid,
        in_specs=[pl.BlockSpec((D, TB), lambda i: (0, i))]
                 + [const_spec(a) for a in consts],
        out_specs=(pl.BlockSpec((F + 1, D, TB), lambda i: (0, 0, i)),
                   pl.BlockSpec((2, TB), lambda i: (0, i))),
        out_shape=(jax.ShapeDtypeStruct((F + 1, D, B), jnp.float32),
                   jax.ShapeDtypeStruct((2, B), jnp.float32)),
        compiler_params=pltpu.CompilerParams(**cp_kwargs),
    )(xT, *consts)
    return zsT, stats


@jax.jit
def normalizing_flow_model_forward(x, packed):
    """NormalizingFlowModel.forward == forward_sample(x, con_in=None).

    Returns (zs stacked as (F+1, B, D), base_logprob (B,), log_det (B,)).
    (The reference's .view(B,-1).sum(1) is a no-op on a per-row log_prob vector.)
    """
    zsT, stats = fused_forward_T(x.T, packed)        # transpose to batch-on-lanes under jit
    zs = jnp.swapaxes(zsT, 1, 2)                     # (F+1, B, D), one fused transpose
    return zs, stats[1], stats[0]
    # TODO(synk): add a z_final-only variant (skip intermediate zs writeback) for
    # log_prob-style callers — forward's semantics require all intermediates.


# -----------------------------------------------------------------------------
# Parameter init (per-flow s/t MLPs, stacked along a leading axis of 2 like the
# nflib AffineHalfFlow conditioners) and packing into the fused kernel layout.
# -----------------------------------------------------------------------------
def init_flow_params(key, num_flows, half_dim, nh):
    params = []
    for _ in range(num_flows):
        key, *sub = jax.random.split(key, 9)
        params.append({
            "w1": jax.random.normal(sub[0], (2, half_dim, nh), jnp.float32) * 0.1,
            "b1": jax.random.normal(sub[1], (2, nh), jnp.float32) * 0.01,
            "w2": jax.random.normal(sub[2], (2, nh, nh), jnp.float32) * 0.1,
            "b2": jax.random.normal(sub[3], (2, nh), jnp.float32) * 0.01,
            "w3": jax.random.normal(sub[4], (2, nh, nh), jnp.float32) * 0.1,
            "b3": jax.random.normal(sub[5], (2, nh), jnp.float32) * 0.01,
            "w4": jax.random.normal(sub[6], (2, nh, half_dim), jnp.float32) * 0.1,
            "b4": jax.random.normal(sub[7], (2, half_dim), jnp.float32) * 0.01,
        })
    return params


def pack_flow_params(flow_params, D, compute_dtype=jnp.bfloat16):
    """Merge the s/t MLPs and fold even/odd split + parity into transposed weights.

    Matmul operands are stored in `compute_dtype` (bf16: ~3x MXU throughput, half the
    weight VMEM/DMA); biases and the de-interleave permutation stay f32 (applied after
    f32 accumulation).  The zero pass-through blocks are exact in bf16.
    """
    H = D // 2
    F = len(flow_params)
    NH = int(flow_params[0]["w1"].shape[-1])
    # TODO(synk): on v5e with NH >= 128 split the block-diagonal W2/W3 back into two
    # (NH, NH) matmuls (its 128-wide MXU would spend half its tiles on zeros).
    W1 = np.zeros((F, 2 * NH, D), np.float32)
    B1 = np.zeros((F, 2 * NH, 1), np.float32)
    W2 = np.zeros((F, 2 * NH, 2 * NH), np.float32)
    B2 = np.zeros((F, 2 * NH, 1), np.float32)
    W3 = np.zeros((F, 2 * NH, 2 * NH), np.float32)
    B3 = np.zeros((F, 2 * NH, 1), np.float32)
    W4S = np.zeros((F, D, 2 * NH), np.float32)
    B4S = np.zeros((F, D, 1), np.float32)
    W4T = np.zeros((F, D, 2 * NH), np.float32)
    B4T = np.zeros((F, D, 1), np.float32)
    for k, p in enumerate(flow_params):
        parity = k % 2
        w1, b1 = np.asarray(p["w1"]), np.asarray(p["b1"])
        w2, b2 = np.asarray(p["w2"]), np.asarray(p["b2"])
        w3, b3 = np.asarray(p["w3"]), np.asarray(p["b3"])
        w4, b4 = np.asarray(p["w4"]), np.asarray(p["b4"])
        # conditioner reads the even (parity=0) / odd (parity=1) feature columns of raw x
        for i in range(H):
            j = 2 * i + parity
            W1[k, :NH, j] = w1[0][i]          # s-path
            W1[k, NH:, j] = w1[1][i]          # t-path
        B1[k, :NH, 0], B1[k, NH:, 0] = b1[0], b1[1]
        # block-diagonal hidden layers keep s in rows [0,NH) and t in rows [NH,2NH)
        W2[k, :NH, :NH], W2[k, NH:, NH:] = w2[0].T, w2[1].T
        B2[k, :NH, 0], B2[k, NH:, 0] = b2[0], b2[1]
        W3[k, :NH, :NH], W3[k, NH:, NH:] = w3[0].T, w3[1].T
        B3[k, :NH, 0], B3[k, NH:, 0] = b3[0], b3[1]
        # layer 4 drops s / t onto the transformed-half rows of the (de-interleaved)
        # next state: rows [H, 2H) for parity=0, rows [0, H) for parity=1.
        c0 = 0 if parity else H
        W4S[k, c0:c0 + H, :NH] = w4[0].T
        B4S[k, c0:c0 + H, 0] = b4[0]
        W4T[k, c0:c0 + H, NH:] = w4[1].T
        B4T[k, c0:c0 + H, 0] = b4[1]
    # de-interleaved state = PT @ x : row j <- x row 2j, row H+j <- x row 2j+1
    PT = np.zeros((D, D), np.float32)
    PT[np.arange(H), np.arange(0, D, 2)] = 1.0
    PT[np.arange(H, D), np.arange(1, D, 2)] = 1.0
    return {
        "PT": jnp.asarray(PT),
        "w1": jnp.asarray(W1, dtype=compute_dtype), "b1": jnp.asarray(B1),
        "w2": jnp.asarray(W2, dtype=compute_dtype), "b2": jnp.asarray(B2),
        "w3": jnp.asarray(W3, dtype=compute_dtype), "b3": jnp.asarray(B3),
        "w4s": jnp.asarray(W4S, dtype=compute_dtype), "b4s": jnp.asarray(B4S),
        "w4t": jnp.asarray(W4T, dtype=compute_dtype), "b4t": jnp.asarray(B4T),
    }


# -----------------------------------------------------------------------------
# Pure-JAX reference (mirrors the PyTorch control flow) for a correctness check.
# -----------------------------------------------------------------------------
def _reference_forward(x, flow_params):
    B, D = x.shape
    log_det = jnp.zeros((B,), jnp.float32)
    zs = [x]
    for k, p in enumerate(flow_params):
        parity = k % 2
        x0, x1 = x[:, ::2], x[:, 1::2]
        if parity:
            x0, x1 = x1, x0

        def mlp(i):
            h = _leaky(x0 @ p["w1"][i] + p["b1"][i])
            h = _leaky(h @ p["w2"][i] + p["b2"][i])
            h = _leaky(h @ p["w3"][i] + p["b3"][i])
            return h @ p["w4"][i] + p["b4"][i]

        s, t = mlp(0), mlp(1)
        z1 = jnp.exp(s) * x1 + t
        z0 = x0
        if parity:
            z0, z1 = z1, z0
        x = jnp.concatenate([z0, z1], axis=1)
        log_det = log_det + jnp.sum(s, axis=1)
        zs.append(x)
    base_lp = -0.5 * D * _LOG_2PI - 0.5 * jnp.sum(x * x, axis=1)
    return zs, base_lp, log_det


if __name__ == "__main__":
    # TODO(synk): conditional path (con_in + cond_layer MLP, prep_con=True) is not exercised;
    # forward runs with con_in=None exactly as the reference permits.
    B, D, NH, NUM_FLOWS = 8, 8, 32, 4
    key = jax.random.PRNGKey(0)
    kx, kp = jax.random.split(key)
    x = jax.random.normal(kx, (B, D), jnp.float32)
    flow_params = init_flow_params(kp, NUM_FLOWS, D // 2, NH)
    packed = pack_flow_params(flow_params, D)

    zs, base_logprob, log_det = normalizing_flow_model_forward(x, packed)
    jax.block_until_ready(zs)
    jax.block_until_ready(base_logprob)
    jax.block_until_ready(log_det)

    # shape / sanity checks
    assert zs.shape == (NUM_FLOWS + 1, B, D)
    assert base_logprob.shape == (B,)
    assert log_det.shape == (B,)
    assert bool(jnp.all(jnp.isfinite(zs)))
    assert bool(jnp.all(jnp.isfinite(base_logprob)))
    assert bool(jnp.all(jnp.isfinite(log_det)))

    # numerical check against the plain-JAX reference of the PyTorch module
    # (2e-2 tolerance covers the bf16 MXU operands; state/elementwise math stays f32)
    zs_ref, lp_ref, ld_ref = _reference_forward(x, flow_params)
    tol = dict(rtol=2e-2, atol=2e-2)
    for i in range(NUM_FLOWS + 1):
        assert bool(jnp.allclose(zs[i], zs_ref[i], **tol)), f"zs[{i}] mismatch vs reference"
    assert bool(jnp.allclose(base_logprob, lp_ref, **tol)), "base log_prob mismatch"
    assert bool(jnp.allclose(log_det, ld_ref, **tol)), "log_det mismatch"

    print("KERNEL_OK")
</pallas_src>

<mosaic_0001>
module attributes {stable_mosaic.version = 11 : i64} {
  func.func @_fused_flow_kernel(%arg0: i32, %arg1: memref<8x8xf32, #tpu.memory_space<vmem>>, %arg2: memref<8x8xf32, #tpu.memory_space<vmem>>, %arg3: memref<4x64x8xbf16, #tpu.memory_space<vmem>>, %arg4: memref<4x64x1xf32, #tpu.memory_space<vmem>>, %arg5: memref<4x64x64xbf16, #tpu.memory_space<vmem>>, %arg6: memref<4x64x1xf32, #tpu.memory_space<vmem>>, %arg7: memref<4x64x64xbf16, #tpu.memory_space<vmem>>, %arg8: memref<4x64x1xf32, #tpu.memory_space<vmem>>, %arg9: memref<4x8x64xbf16, #tpu.memory_space<vmem>>, %arg10: memref<4x8x1xf32, #tpu.memory_space<vmem>>, %arg11: memref<4x8x64xbf16, #tpu.memory_space<vmem>>, %arg12: memref<4x8x1xf32, #tpu.memory_space<vmem>>, %arg13: memref<5x8x8xf32, #tpu.memory_space<vmem>>, %arg14: memref<2x8xf32, #tpu.memory_space<vmem>>) attributes {dimension_semantics = [#tpu.dimension_semantics<parallel>], iteration_bounds = array<i64: 1>, scalar_prefetch = 0 : i64, scratch_operands = 0 : i64, tpu.core_type = #tpu.core_type<tc>, window_params = [{transform_indices = @transform_0, window_bounds = array<i64: 8, 8>}, {pipeline_mode = #tpu.pipeline_mode<synchronous>, transform_indices = @transform_1, window_bounds = array<i64: 8, 8>}, {pipeline_mode = #tpu.pipeline_mode<synchronous>, transform_indices = @transform_2, window_bounds = array<i64: 4, 64, 8>}, {pipeline_mode = #tpu.pipeline_mode<synchronous>, transform_indices = @transform_3, window_bounds = array<i64: 4, 64, 1>}, {pipeline_mode = #tpu.pipeline_mode<synchronous>, transform_indices = @transform_4, window_bounds = array<i64: 4, 64, 64>}, {pipeline_mode = #tpu.pipeline_mode<synchronous>, transform_indices = @transform_5, window_bounds = array<i64: 4, 64, 1>}, {pipeline_mode = #tpu.pipeline_mode<synchronous>, transform_indices = @transform_6, window_bounds = array<i64: 4, 64, 64>}, {pipeline_mode = #tpu.pipeline_mode<synchronous>, transform_indices = @transform_7, window_bounds = array<i64: 4, 64, 1>}, {pipeline_mode = #tpu.pipeline_mode<synchronous>, transform_indices = @transform_8, window_bounds = array<i64: 4, 8, 64>}, {pipeline_mode = #tpu.pipeline_mode<synchronous>, transform_indices = @transform_9, window_bounds = array<i64: 4, 8, 1>}, {pipeline_mode = #tpu.pipeline_mode<synchronous>, transform_indices = @transform_10, window_bounds = array<i64: 4, 8, 64>}, {pipeline_mode = #tpu.pipeline_mode<synchronous>, transform_indices = @transform_11, window_bounds = array<i64: 4, 8, 1>}, {transform_indices = @transform_12, window_bounds = array<i64: 5, 8, 8>}, {transform_indices = @transform_13, window_bounds = array<i64: 2, 8>}]} {
    %c0 = arith.constant 0 : index
    %c0_0 = arith.constant 0 : index
    %0 = vector.load %arg1[%c0, %c0_0] : memref<8x8xf32, #tpu.memory_space<vmem>>, vector<8x8xf32>
    %c0_1 = arith.constant 0 : index
    %c0_2 = arith.constant 0 : index
    %1 = vector.load %arg2[%c0_1, %c0_2] : memref<8x8xf32, #tpu.memory_space<vmem>>, vector<8x8xf32>
    %c0_3 = arith.constant 0 : index
    %c0_4 = arith.constant 0 : index
    %c0_5 = arith.constant 0 : index
    %2 = vector.load %arg13[%c0_3, %c0_4, %c0_5] : memref<5x8x8xf32, #tpu.memory_space<vmem>>, vector<1x8x8xf32>
    %3 = vector.shape_cast %2 : vector<1x8x8xf32> to vector<8x8xf32>
    %4 = vector.shape_cast %0 : vector<8x8xf32> to vector<1x8x8xf32>
    tpu.vector_store %arg13[%c0_3, %c0_4, %c0_5], %4 {strides = array<i32>} : memref<5x8x8xf32, #tpu.memory_space<vmem>>, vector<1x8x8xf32>,
    %cst = arith.constant 0.000000e+00 : f32
    %5 = vector.broadcast %cst : f32 to vector<1x8xf32>
    %cst_6 = arith.constant dense<0.000000e+00> : vector<8x8xf32>
    %6 = tpu.matmul %1, %0, %cst_6 {dimension_numbers = #tpu.dot_dimension_numbers<[1], [0], [0], [1], [0, 0, 1, 1], [], []>} : vector<8x8xf32>, vector<8x8xf32>, vector<8x8xf32> -> vector<8x8xf32>
    %c0_7 = arith.constant 0 : index
    %c0_8 = arith.constant 0 : index
    %c0_9 = arith.constant 0 : index
    %7 = vector.load %arg3[%c0_7, %c0_8, %c0_9] : memref<4x64x8xbf16, #tpu.memory_space<vmem>>, vector<1x64x8xbf16>
    %8 = vector.shape_cast %7 : vector<1x64x8xbf16> to vector<64x8xbf16>
    %9 = arith.truncf %0 : vector<8x8xf32> to vector<8x8xbf16>
    %cst_10 = arith.constant dense<0.000000e+00> : vector<64x8xf32>
    %10 = tpu.matmul %8, %9, %cst_10 {dimension_numbers = #tpu.dot_dimension_numbers<[1], [0], [0], [1], [0, 0, 1, 1], [], []>} : vector<64x8xbf16>, vector<8x8xbf16>, vector<64x8xf32> -> vector<64x8xf32>
    %c0_11 = arith.constant 0 : index
    %c0_12 = arith.constant 0 : index
    %c0_13 = arith.constant 0 : index
    %11 = vector.load %arg4[%c0_11, %c0_12, %c0_13] : memref<4x64x1xf32, #tpu.memory_space<vmem>>, vector<1x64x1xf32>
    %12 = vector.shape_cast %11 : vector<1x64x1xf32> to vector<64x1xf32>
    %13 = vector.broadcast %12 : vector<64x1xf32> to vector<64x8xf32>
    %14 = arith.addf %10, %13 : vector<64x8xf32>
    %cst_14 = arith.constant 0.000000e+00 : f32
    %15 = vector.broadcast %cst_14 : f32 to vector<64x8xf32>
    %16 = arith.cmpf ogt, %14, %15 : vector<64x8xf32>
    %cst_15 = arith.constant 2.000000e-01 : f32
    %17 = vector.broadcast %cst_15 : f32 to vector<64x8xf32>
    %18 = arith.mulf %17, %14 : vector<64x8xf32>
    %19 = arith.select %16, %14, %18 : vector<64x8xi1>, vector<64x8xf32>
    %c0_16 = arith.constant 0 : index
    %c0_17 = arith.constant 0 : index
    %c0_18 = arith.constant 0 : index
    %20 = vector.load %arg5[%c0_16, %c0_17, %c0_18] : memref<4x64x64xbf16, #tpu.memory_space<vmem>>, vector<1x64x64xbf16>
    %21 = vector.shape_cast %20 : vector<1x64x64xbf16> to vector<64x64xbf16>
    %22 = arith.truncf %19 : vector<64x8xf32> to vector<64x8xbf16>
    %cst_19 = arith.constant dense<0.000000e+00> : vector<64x8xf32>
    %23 = tpu.matmul %21, %22, %cst_19 {dimension_numbers = #tpu.dot_dimension_numbers<[1], [0], [0], [1], [0, 0, 1, 1], [], []>} : vector<64x64xbf16>, vector<64x8xbf16>, vector<64x8xf32> -> vector<64x8xf32>
    %c0_20 = arith.constant 0 : index
    %c0_21 = arith.constant 0 : index
    %c0_22 = arith.constant 0 : index
    %24 = vector.load %arg6[%c0_20, %c0_21, %c0_22] : memref<4x64x1xf32, #tpu.memory_space<vmem>>, vector<1x64x1xf32>
    %25 = vector.shape_cast %24 : vector<1x64x1xf32> to vector<64x1xf32>
    %26 = vector.broadcast %25 : vector<64x1xf32> to vector<64x8xf32>
    %27 = arith.addf %23, %26 : vector<64x8xf32>
    %cst_23 = arith.constant 0.000000e+00 : f32
    %28 = vector.broadcast %cst_23 : f32 to vector<64x8xf32>
    %29 = arith.cmpf ogt, %27, %28 : vector<64x8xf32>
    %cst_24 = arith.constant 2.000000e-01 : f32
    %30 = vector.broadcast %cst_24 : f32 to vector<64x8xf32>
    %31 = arith.mulf %30, %27 : vector<64x8xf32>
    %32 = arith.select %29, %27, %31 : vector<64x8xi1>, vector<64x8xf32>
    %c0_25 = arith.constant 0 : index
    %c0_26 = arith.constant 0 : index
    %c0_27 = arith.constant 0 : index
    %33 = vector.load %arg7[%c0_25, %c0_26, %c0_27] : memref<4x64x64xbf16, #tpu.memory_space<vmem>>, vector<1x64x64xbf16>
    %34 = vector.shape_cast %33 : vector<1x64x64xbf16> to vector<64x64xbf16>
    %35 = arith.truncf %32 : vector<64x8xf32> to vector<64x8xbf16>
    %cst_28 = arith.constant dense<0.000000e+00> : vector<64x8xf32>
    %36 = tpu.matmul %34, %35, %cst_28 {dimension_numbers = #tpu.dot_dimension_numbers<[1], [0], [0], [1], [0, 0, 1, 1], [], []>} : vector<64x64xbf16>, vector<64x8xbf16>, vector<64x8xf32> -> vector<64x8xf32>
    %c0_29 = arith.constant 0 : index
    %c0_30 = arith.constant 0 : index
    %c0_31 = arith.constant 0 : index
    %37 = vector.load %arg8[%c0_29, %c0_30, %c0_31] : memref<4x64x1xf32, #tpu.memory_space<vmem>>, vector<1x64x1xf32>
    %38 = vector.shape_cast %37 : vector<1x64x1xf32> to vector<64x1xf32>
    %39 = vector.broadcast %38 : vector<64x1xf32> to vector<64x8xf32>
    %40 = arith.addf %36, %39 : vector<64x8xf32>
    %cst_32 = arith.constant 0.000000e+00 : f32
    %41 = vector.broadcast %cst_32 : f32 to vector<64x8xf32>
    %42 = arith.cmpf ogt, %40, %41 : vector<64x8xf32>
    %cst_33 = arith.constant 2.000000e-01 : f32
    %43 = vector.broadcast %cst_33 : f32 to vector<64x8xf32>
    %44 = arith.mulf %43, %40 : vector<64x8xf32>
    %45 = arith.select %42, %40, %44 : vector<64x8xi1>, vector<64x8xf32>
    %46 = arith.truncf %45 : vector<64x8xf32> to vector<64x8xbf16>
    %c0_34 = arith.constant 0 : index
    %c0_35 = arith.constant 0 : index
    %c0_36 = arith.constant 0 : index
    %47 = vector.load %arg9[%c0_34, %c0_35, %c0_36] : memref<4x8x64xbf16, #tpu.memory_space<vmem>>, vector<1x8x64xbf16>
    %48 = vector.shape_cast %47 : vector<1x8x64xbf16> to vector<8x64xbf16>
    %cst_37 = arith.constant dense<0.000000e+00> : vector<8x8xf32>
    %49 = tpu.matmul %48, %46, %cst_37 {dimension_numbers = #tpu.dot_dimension_numbers<[1], [0], [0], [1], [0, 0, 1, 1], [], []>} : vector<8x64xbf16>, vector<64x8xbf16>, vector<8x8xf32> -> vector<8x8xf32>
    %c0_38 = arith.constant 0 : index
    %c0_39 = arith.constant 0 : index
    %c0_40 = arith.constant 0 : index
    %50 = vector.load %arg10[%c0_38, %c0_39, %c0_40] : memref<4x8x1xf32, #tpu.memory_space<vmem>>, vector<1x8x1xf32>
    %51 = vector.shape_cast %50 : vector<1x8x1xf32> to vector<8x1xf32>
    %52 = vector.broadcast %51 : vector<8x1xf32> to vector<8x8xf32>
    %53 = arith.addf %49, %52 : vector<8x8xf32>
    %c0_41 = arith.constant 0 : index
    %c0_42 = arith.constant 0 : index
    %c0_43 = arith.constant 0 : index
    %54 = vector.load %arg11[%c0_41, %c0_42, %c0_43] : memref<4x8x64xbf16, #tpu.memory_space<vmem>>, vector<1x8x64xbf16>
    %55 = vector.shape_cast %54 : vector<1x8x64xbf16> to vector<8x64xbf16>
    %cst_44 = arith.constant dense<0.000000e+00> : vector<8x8xf32>
    %56 = tpu.matmul %55, %46, %cst_44 {dimension_numbers = #tpu.dot_dimension_numbers<[1], [0], [0], [1], [0, 0, 1, 1], [], []>} : vector<8x64xbf16>, vector<64x8xbf16>, vector<8x8xf32> -> vector<8x8xf32>
    %c0_45 = arith.constant 0 : index
    %c0_46 = arith.constant 0 : index
    %c0_47 = arith.constant 0 : index
    %57 = vector.load %arg12[%c0_45, %c0_46, %c0_47] : memref<4x8x1xf32, #tpu.memory_space<vmem>>, vector<1x8x1xf32>
    %58 = vector.shape_cast %57 : vector<1x8x1xf32> to vector<8x1xf32>
    %59 = vector.broadcast %58 : vector<8x1xf32> to vector<8x8xf32>
    %60 = arith.addf %56, %59 : vector<8x8xf32>
    %61 = math.exp %53 : vector<8x8xf32>
    %62 = arith.mulf %61, %6 : vector<8x8xf32>
    %63 = arith.addf %62, %60 : vector<8x8xf32>
    %cst_48 = arith.constant dense<0.000000e+00> : vector<8xf32>
    %64 = vector.multi_reduction <add>, %53, %cst_48 [0] : vector<8x8xf32> to vector<8xf32>
    %65 = vector.shape_cast %64 : vector<8xf32> to vector<1x8xf32>
    %66 = arith.addf %5, %65 : vector<1x8xf32>
    %c1 = arith.constant 1 : index
    %c0_49 = arith.constant 0 : index
    %c0_50 = arith.constant 0 : index
    %67 = vector.load %arg13[%c1, %c0_49, %c0_50] : memref<5x8x8xf32, #tpu.memory_space<vmem>>, vector<1x8x8xf32>
    %68 = vector.shape_cast %67 : vector<1x8x8xf32> to vector<8x8xf32>
    %69 = vector.shape_cast %63 : vector<8x8xf32> to vector<1x8x8xf32>
    tpu.vector_store %arg13[%c1, %c0_49, %c0_50], %69 {strides = array<i32>} : memref<5x8x8xf32, #tpu.memory_space<vmem>>, vector<1x8x8xf32>,
    %cst_51 = arith.constant dense<0.000000e+00> : vector<8x8xf32>
    %70 = tpu.matmul %1, %63, %cst_51 {dimension_numbers = #tpu.dot_dimension_numbers<[1], [0], [0], [1], [0, 0, 1, 1], [], []>} : vector<8x8xf32>, vector<8x8xf32>, vector<8x8xf32> -> vector<8x8xf32>
    %c1_52 = arith.constant 1 : index
    %c0_53 = arith.constant 0 : index
    %c0_54 = arith.constant 0 : index
    %71 = vector.load %arg3[%c1_52, %c0_53, %c0_54] : memref<4x64x8xbf16, #tpu.memory_space<vmem>>, vector<1x64x8xbf16>
    %72 = vector.shape_cast %71 : vector<1x64x8xbf16> to vector<64x8xbf16>
    %73 = arith.truncf %63 : vector<8x8xf32> to vector<8x8xbf16>
    %cst_55 = arith.constant dense<0.000000e+00> : vector<64x8xf32>
    %74 = tpu.matmul %72, %73, %cst_55 {dimension_numbers = #tpu.dot_dimension_numbers<[1], [0], [0], [1], [0, 0, 1, 1], [], []>} : vector<64x8xbf16>, vector<8x8xbf16>, vector<64x8xf32> -> vector<64x8xf32>
    %c1_56 = arith.constant 1 : index
    %c0_57 = arith.constant 0 : index
    %c0_58 = arith.constant 0 : index
    %75 = vector.load %arg4[%c1_56, %c0_57, %c0_58] : memref<4x64x1xf32, #tpu.memory_space<vmem>>, vector<1x64x1xf32>
    %76 = vector.shape_cast %75 : vector<1x64x1xf32> to vector<64x1xf32>
    %77 = vector.broadcast %76 : vector<64x1xf32> to vector<64x8xf32>
    %78 = arith.addf %74, %77 : vector<64x8xf32>
    %cst_59 = arith.constant 0.000000e+00 : f32
    %79 = vector.broadcast %cst_59 : f32 to vector<64x8xf32>
    %80 = arith.cmpf ogt, %78, %79 : vector<64x8xf32>
    %cst_60 = arith.constant 2.000000e-01 : f32
    %81 = vector.broadcast %cst_60 : f32 to vector<64x8xf32>
    %82 = arith.mulf %81, %78 : vector<64x8xf32>
    %83 = arith.select %80, %78, %82 : vector<64x8xi1>, vector<64x8xf32>
    %c1_61 = arith.constant 1 : index
    %c0_62 = arith.constant 0 : index
    %c0_63 = arith.constant 0 : index
    %84 = vector.load %arg5[%c1_61, %c0_62, %c0_63] : memref<4x64x64xbf16, #tpu.memory_space<vmem>>, vector<1x64x64xbf16>
    %85 = vector.shape_cast %84 : vector<1x64x64xbf16> to vector<64x64xbf16>
    %86 = arith.truncf %83 : vector<64x8xf32> to vector<64x8xbf16>
    %cst_64 = arith.constant dense<0.000000e+00> : vector<64x8xf32>
    %87 = tpu.matmul %85, %86, %cst_64 {dimension_numbers = #tpu.dot_dimension_numbers<[1], [0], [0], [1], [0, 0, 1, 1], [], []>} : vector<64x64xbf16>, vector<64x8xbf16>, vector<64x8xf32> -> vector<64x8xf32>
    %c1_65 = arith.constant 1 : index
    %c0_66 = arith.constant 0 : index
    %c0_67 = arith.constant 0 : index
    %88 = vector.load %arg6[%c1_65, %c0_66, %c0_67] : memref<4x64x1xf32, #tpu.memory_space<vmem>>, vector<1x64x1xf32>
    %89 = vector.shape_cast %88 : vector<1x64x1xf32> to vector<64x1xf32>
    %90 = vector.broadcast %89 : vector<64x1xf32> to vector<64x8xf32>
    %91 = arith.addf %87, %90 : vector<64x8xf32>
    %cst_68 = arith.constant 0.000000e+00 : f32
    %92 = vector.broadcast %cst_68 : f32 to vector<64x8xf32>
    %93 = arith.cmpf ogt, %91, %92 : vector<64x8xf32>
    %cst_69 = arith.constant 2.000000e-01 : f32
    %94 = vector.broadcast %cst_69 : f32 to vector<64x8xf32>
    %95 = arith.mulf %94, %91 : vector<64x8xf32>
    %96 = arith.select %93, %91, %95 : vector<64x8xi1>, vector<64x8xf32>
    %c1_70 = arith.constant 1 : index
    %c0_71 = arith.constant 0 : index
    %c0_72 = arith.constant 0 : index
    %97 = vector.load %arg7[%c1_70, %c0_71, %c0_72] : memref<4x64x64xbf16, #tpu.memory_space<vmem>>, vector<1x64x64xbf16>
    %98 = vector.shape_cast %97 : vector<1x64x64xbf16> to vector<64x64xbf16>
    %99 = arith.truncf %96 : vector<64x8xf32> to vector<64x8xbf16>
    %cst_73 = arith.constant dense<0.000000e+00> : vector<64x8xf32>
    %100 = tpu.matmul %98, %99, %cst_73 {dimension_numbers = #tpu.dot_dimension_numbers<[1], [0], [0], [1], [0, 0, 1, 1], [], []>} : vector<64x64xbf16>, vector<64x8xbf16>, vector<64x8xf32> -> vector<64x8xf32>
    %c1_74 = arith.constant 1 : index
    %c0_75 = arith.constant 0 : index
    %c0_76 = arith.constant 0 : index
    %101 = vector.load %arg8[%c1_74, %c0_75, %c0_76] : memref<4x64x1xf32, #tpu.memory_space<vmem>>, vector<1x64x1xf32>
    %102 = vector.shape_cast %101 : vector<1x64x1xf32> to vector<64x1xf32>
    %103 = vector.broadcast %102 : vector<64x1xf32> to vector<64x8xf32>
    %104 = arith.addf %100, %103 : vector<64x8xf32>
    %cst_77 = arith.constant 0.000000e+00 : f32
    %105 = vector.broadcast %cst_77 : f32 to vector<64x8xf32>
    %106 = arith.cmpf ogt, %104, %105 : vector<64x8xf32>
    %cst_78 = arith.constant 2.000000e-01 : f32
    %107 = vector.broadcast %cst_78 : f32 to vector<64x8xf32>
    %108 = arith.mulf %107, %104 : vector<64x8xf32>
    %109 = arith.select %106, %104, %108 : vector<64x8xi1>, vector<64x8xf32>
    %110 = arith.truncf %109 : vector<64x8xf32> to vector<64x8xbf16>
    %c1_79 = arith.constant 1 : index
    %c0_80 = arith.constant 0 : index
    %c0_81 = arith.constant 0 : index
    %111 = vector.load %arg9[%c1_79, %c0_80, %c0_81] : memref<4x8x64xbf16, #tpu.memory_space<vmem>>, vector<1x8x64xbf16>
    %112 = vector.shape_cast %111 : vector<1x8x64xbf16> to vector<8x64xbf16>
    %cst_82 = arith.constant dense<0.000000e+00> : vector<8x8xf32>
    %113 = tpu.matmul %112, %110, %cst_82 {dimension_numbers = #tpu.dot_dimension_numbers<[1], [0], [0], [1], [0, 0, 1, 1], [], []>} : vector<8x64xbf16>, vector<64x8xbf16>, vector<8x8xf32> -> vector<8x8xf32>
    %c1_83 = arith.constant 1 : index
    %c0_84 = arith.constant 0 : index
    %c0_85 = arith.constant 0 : index
    %114 = vector.load %arg10[%c1_83, %c0_84, %c0_85] : memref<4x8x1xf32, #tpu.memory_space<vmem>>, vector<1x8x1xf32>
    %115 = vector.shape_cast %114 : vector<1x8x1xf32> to vector<8x1xf32>
    %116 = vector.broadcast %115 : vector<8x1xf32> to vector<8x8xf32>
    %117 = arith.addf %113, %116 : vector<8x8xf32>
    %c1_86 = arith.constant 1 : index
    %c0_87 = arith.constant 0 : index
    %c0_88 = arith.constant 0 : index
    %118 = vector.load %arg11[%c1_86, %c0_87, %c0_88] : memref<4x8x64xbf16, #tpu.memory_space<vmem>>, vector<1x8x64xbf16>
    %119 = vector.shape_cast %118 : vector<1x8x64xbf16> to vector<8x64xbf16>
    %cst_89 = arith.constant dense<0.000000e+00> : vector<8x8xf32>
    %120 = tpu.matmul %119, %110, %cst_89 {dimension_numbers = #tpu.dot_dimension_numbers<[1], [0], [0], [1], [0, 0, 1, 1], [], []>} : vector<8x64xbf16>, vector<64x8xbf16>, vector<8x8xf32> -> vector<8x8xf32>
    %c1_90 = arith.constant 1 : index
    %c0_91 = arith.constant 0 : index
    %c0_92 = arith.constant 0 : index
    %121 = vector.load %arg12[%c1_90, %c0_91, %c0_92] : memref<4x8x1xf32, #tpu.memory_space<vmem>>, vector<1x8x1xf32>
    %122 = vector.shape_cast %121 : vector<1x8x1xf32> to vector<8x1xf32>
    %123 = vector.broadcast %122 : vector<8x1xf32> to vector<8x8xf32>
    %124 = arith.addf %120, %123 : vector<8x8xf32>
    %125 = math.exp %117 : vector<8x8xf32>
    %126 = arith.mulf %125, %70 : vector<8x8xf32>
    %127 = arith.addf %126, %124 : vector<8x8xf32>
    %cst_93 = arith.constant dense<0.000000e+00> : vector<8xf32>
    %128 = vector.multi_reduction <add>, %117, %cst_93 [0] : vector<8x8xf32> to vector<8xf32>
    %129 = vector.shape_cast %128 : vector<8xf32> to vector<1x8xf32>
    %130 = arith.addf %66, %129 : vector<1x8xf32>
    %c2 = arith.constant 2 : index
    %c0_94 = arith.constant 0 : index
    %c0_95 = arith.constant 0 : index
    %131 = vector.load %arg13[%c2, %c0_94, %c0_95] : memref<5x8x8xf32, #tpu.memory_space<vmem>>, vector<1x8x8xf32>
    %132 = vector.shape_cast %131 : vector<1x8x8xf32> to vector<8x8xf32>
    %133 = vector.shape_cast %127 : vector<8x8xf32> to vector<1x8x8xf32>
    tpu.vector_store %arg13[%c2, %c0_94, %c0_95], %133 {strides = array<i32>} : memref<5x8x8xf32, #tpu.memory_space<vmem>>, vector<1x8x8xf32>,
    %cst_96 = arith.constant dense<0.000000e+00> : vector<8x8xf32>
    %134 = tpu.matmul %1, %127, %cst_96 {dimension_numbers = #tpu.dot_dimension_numbers<[1], [0], [0], [1], [0, 0, 1, 1], [], []>} : vector<8x8xf32>, vector<8x8xf32>, vector<8x8xf32> -> vector<8x8xf32>
    %c2_97 = arith.constant 2 : index
    %c0_98 = arith.constant 0 : index
    %c0_99 = arith.constant 0 : index
    %135 = vector.load %arg3[%c2_97, %c0_98, %c0_99] : memref<4x64x8xbf16, #tpu.memory_space<vmem>>, vector<1x64x8xbf16>
    %136 = vector.shape_cast %135 : vector<1x64x8xbf16> to vector<64x8xbf16>
    %137 = arith.truncf %127 : vector<8x8xf32> to vector<8x8xbf16>
    %cst_100 = arith.constant dense<0.000000e+00> : vector<64x8xf32>
    %138 = tpu.matmul %136, %137, %cst_100 {dimension_numbers = #tpu.dot_dimension_numbers<[1], [0], [0], [1], [0, 0, 1, 1], [], []>} : vector<64x8xbf16>, vector<8x8xbf16>, vector<64x8xf32> -> vector<64x8xf32>
    %c2_101 = arith.constant 2 : index
    %c0_102 = arith.constant 0 : index
    %c0_103 = arith.constant 0 : index
    %139 = vector.load %arg4[%c2_101, %c0_102, %c0_103] : memref<4x64x1xf32, #tpu.memory_space<vmem>>, vector<1x64x1xf32>
    %140 = vector.shape_cast %139 : vector<1x64x1xf32> to vector<64x1xf32>
    %141 = vector.broadcast %140 : vector<64x1xf32> to vector<64x8xf32>
    %142 = arith.addf %138, %141 : vector<64x8xf32>
    %cst_104 = arith.constant 0.000000e+00 : f32
    %143 = vector.broadcast %cst_104 : f32 to vector<64x8xf32>
    %144 = arith.cmpf ogt, %142, %143 : vector<64x8xf32>
    %cst_105 = arith.constant 2.000000e-01 : f32
    %145 = vector.broadcast %cst_105 : f32 to vector<64x8xf32>
    %146 = arith.mulf %145, %142 : vector<64x8xf32>
    %147 = arith.select %144, %142, %146 : vector<64x8xi1>, vector<64x8xf32>
    %c2_106 = arith.constant 2 : index
    %c0_107 = arith.constant 0 : index
    %c0_108 = arith.constant 0 : index
    %148 = vector.load %arg5[%c2_106, %c0_107, %c0_108] : memref<4x64x64xbf16, #tpu.memory_space<vmem>>, vector<1x64x64xbf16>
    %149 = vector.shape_cast %148 : vector<1x64x64xbf16> to vector<64x64xbf16>
    %150 = arith.truncf %147 : vector<64x8xf32> to vector<64x8xbf16>
    %cst_109 = arith.constant dense<0.000000e+00> : vector<64x8xf32>
    %151 = tpu.matmul %149, %150, %cst_109 {dimension_numbers = #tpu.dot_dimension_numbers<[1], [0], [0], [1], [0, 0, 1, 1], [], []>} : vector<64x64xbf16>, vector<64x8xbf16>, vector<64x8xf32> -> vector<64x8xf32>
    %c2_110 = arith.constant 2 : index
    %c0_111 = arith.constant 0 : index
    %c0_112 = arith.constant 0 : index
    %152 = vector.load %arg6[%c2_110, %c0_111, %c0_112] : memref<4x64x1xf32, #tpu.memory_space<vmem>>, vector<1x64x1xf32>
    %153 = vector.shape_cast %152 : vector<1x64x1xf32> to vector<64x1xf32>
    %154 = vector.broadcast %153 : vector<64x1xf32> to vector<64x8xf32>
    %155 = arith.addf %151, %154 : vector<64x8xf32>
    %cst_113 = arith.constant 0.000000e+00 : f32
    %156 = vector.broadcast %cst_113 : f32 to vector<64x8xf32>
    %157 = arith.cmpf ogt, %155, %156 : vector<64x8xf32>
    %cst_114 = arith.constant 2.000000e-01 : f32
    %158 = vector.broadcast %cst_114 : f32 to vector<64x8xf32>
    %159 = arith.mulf %158, %155 : vector<64x8xf32>
    %160 = arith.select %157, %155, %159 : vector<64x8xi1>, vector<64x8xf32>
    %c2_115 = arith.constant 2 : index
    %c0_116 = arith.constant 0 : index
    %c0_117 = arith.constant 0 : index
    %161 = vector.load %arg7[%c2_115, %c0_116, %c0_117] : memref<4x64x64xbf16, #tpu.memory_space<vmem>>, vector<1x64x64xbf16>
    %162 = vector.shape_cast %161 : vector<1x64x64xbf16> to vector<64x64xbf16>
    %163 = arith.truncf %160 : vector<64x8xf32> to vector<64x8xbf16>
    %cst_118 = arith.constant dense<0.000000e+00> : vector<64x8xf32>
    %164 = tpu.matmul %162, %163, %cst_118 {dimension_numbers = #tpu.dot_dimension_numbers<[1], [0], [0], [1], [0, 0, 1, 1], [], []>} : vector<64x64xbf16>, vector<64x8xbf16>, vector<64x8xf32> -> vector<64x8xf32>
    %c2_119 = arith.constant 2 : index
    %c0_120 = arith.constant 0 : index
    %c0_121 = arith.constant 0 : index
    %165 = vector.load %arg8[%c2_119, %c0_120, %c0_121] : memref<4x64x1xf32, #tpu.memory_space<vmem>>, vector<1x64x1xf32>
    %166 = vector.shape_cast %165 : vector<1x64x1xf32> to vector<64x1xf32>
    %167 = vector.broadcast %166 : vector<64x1xf32> to vector<64x8xf32>
    %168 = arith.addf %164, %167 : vector<64x8xf32>
    %cst_122 = arith.constant 0.000000e+00 : f32
    %169 = vector.broadcast %cst_122 : f32 to vector<64x8xf32>
    %170 = arith.cmpf ogt, %168, %169 : vector<64x8xf32>
    %cst_123 = arith.constant 2.000000e-01 : f32
    %171 = vector.broadcast %cst_123 : f32 to vector<64x8xf32>
    %172 = arith.mulf %171, %168 : vector<64x8xf32>
    %173 = arith.select %170, %168, %172 : vector<64x8xi1>, vector<64x8xf32>
    %174 = arith.truncf %173 : vector<64x8xf32> to vector<64x8xbf16>
    %c2_124 = arith.constant 2 : index
    %c0_125 = arith.constant 0 : index
    %c0_126 = arith.constant 0 : index
    %175 = vector.load %arg9[%c2_124, %c0_125, %c0_126] : memref<4x8x64xbf16, #tpu.memory_space<vmem>>, vector<1x8x64xbf16>
    %176 = vector.shape_cast %175 : vector<1x8x64xbf16> to vector<8x64xbf16>
    %cst_127 = arith.constant dense<0.000000e+00> : vector<8x8xf32>
    %177 = tpu.matmul %176, %174, %cst_127 {dimension_numbers = #tpu.dot_dimension_numbers<[1], [0], [0], [1], [0, 0, 1, 1], [], []>} : vector<8x64xbf16>, vector<64x8xbf16>, vector<8x8xf32> -> vector<8x8xf32>
    %c2_128 = arith.constant 2 : index
    %c0_129 = arith.constant 0 : index
    %c0_130 = arith.constant 0 : index
    %178 = vector.load %arg10[%c2_128, %c0_129, %c0_130] : memref<4x8x1xf32, #tpu.memory_space<vmem>>, vector<1x8x1xf32>
    %179 = vector.shape_cast %178 : vector<1x8x1xf32> to vector<8x1xf32>
    %180 = vector.broadcast %179 : vector<8x1xf32> to vector<8x8xf32>
    %181 = arith.addf %177, %180 : vector<8x8xf32>
    %c2_131 = arith.constant 2 : index
    %c0_132 = arith.constant 0 : index
    %c0_133 = arith.constant 0 : index
    %182 = vector.load %arg11[%c2_131, %c0_132, %c0_133] : memref<4x8x64xbf16, #tpu.memory_space<vmem>>, vector<1x8x64xbf16>
    %183 = vector.shape_cast %182 : vector<1x8x64xbf16> to vector<8x64xbf16>
    %cst_134 = arith.constant dense<0.000000e+00> : vector<8x8xf32>
    %184 = tpu.matmul %183, %174, %cst_134 {dimension_numbers = #tpu.dot_dimension_numbers<[1], [0], [0], [1], [0, 0, 1, 1], [], []>} : vector<8x64xbf16>, vector<64x8xbf16>, vector<8x8xf32> -> vector<8x8xf32>
    %c2_135 = arith.constant 2 : index
    %c0_136 = arith.constant 0 : index
    %c0_137 = arith.constant 0 : index
    %185 = vector.load %arg12[%c2_135, %c0_136, %c0_137] : memref<4x8x1xf32, #tpu.memory_space<vmem>>, vector<1x8x1xf32>
    %186 = vector.shape_cast %185 : vector<1x8x1xf32> to vector<8x1xf32>
    %187 = vector.broadcast %186 : vector<8x1xf32> to vector<8x8xf32>
    %188 = arith.addf %184, %187 : vector<8x8xf32>
    %189 = math.exp %181 : vector<8x8xf32>
    %190 = arith.mulf %189, %134 : vector<8x8xf32>
    %191 = arith.addf %190, %188 : vector<8x8xf32>
    %cst_138 = arith.constant dense<0.000000e+00> : vector<8xf32>
    %192 = vector.multi_reduction <add>, %181, %cst_138 [0] : vector<8x8xf32> to vector<8xf32>
    %193 = vector.shape_cast %192 : vector<8xf32> to vector<1x8xf32>
    %194 = arith.addf %130, %193 : vector<1x8xf32>
    %c3 = arith.constant 3 : index
    %c0_139 = arith.constant 0 : index
    %c0_140 = arith.constant 0 : index
    %195 = vector.load %arg13[%c3, %c0_139, %c0_140] : memref<5x8x8xf32, #tpu.memory_space<vmem>>, vector<1x8x8xf32>
    %196 = vector.shape_cast %195 : vector<1x8x8xf32> to vector<8x8xf32>
    %197 = vector.shape_cast %191 : vector<8x8xf32> to vector<1x8x8xf32>
    tpu.vector_store %arg13[%c3, %c0_139, %c0_140], %197 {strides = array<i32>} : memref<5x8x8xf32, #tpu.memory_space<vmem>>, vector<1x8x8xf32>,
    %cst_141 = arith.constant dense<0.000000e+00> : vector<8x8xf32>
    %198 = tpu.matmul %1, %191, %cst_141 {dimension_numbers = #tpu.dot_dimension_numbers<[1], [0], [0], [1], [0, 0, 1, 1], [], []>} : vector<8x8xf32>, vector<8x8xf32>, vector<8x8xf32> -> vector<8x8xf32>
    %c3_142 = arith.constant 3 : index
    %c0_143 = arith.constant 0 : index
    %c0_144 = arith.constant 0 : index
    %199 = vector.load %arg3[%c3_142, %c0_143, %c0_144] : memref<4x64x8xbf16, #tpu.memory_space<vmem>>, vector<1x64x8xbf16>
    %200 = vector.shape_cast %199 : vector<1x64x8xbf16> to vector<64x8xbf16>
    %201 = arith.truncf %191 : vector<8x8xf32> to vector<8x8xbf16>
    %cst_145 = arith.constant dense<0.000000e+00> : vector<64x8xf32>
    %202 = tpu.matmul %200, %201, %cst_145 {dimension_numbers = #tpu.dot_dimension_numbers<[1], [0], [0], [1], [0, 0, 1, 1], [], []>} : vector<64x8xbf16>, vector<8x8xbf16>, vector<64x8xf32> -> vector<64x8xf32>
    %c3_146 = arith.constant 3 : index
    %c0_147 = arith.constant 0 : index
    %c0_148 = arith.constant 0 : index
    %203 = vector.load %arg4[%c3_146, %c0_147, %c0_148] : memref<4x64x1xf32, #tpu.memory_space<vmem>>, vector<1x64x1xf32>
    %204 = vector.shape_cast %203 : vector<1x64x1xf32> to vector<64x1xf32>
    %205 = vector.broadcast %204 : vector<64x1xf32> to vector<64x8xf32>
    %206 = arith.addf %202, %205 : vector<64x8xf32>
    %cst_149 = arith.constant 0.000000e+00 : f32
    %207 = vector.broadcast %cst_149 : f32 to vector<64x8xf32>
    %208 = arith.cmpf ogt, %206, %207 : vector<64x8xf32>
    %cst_150 = arith.constant 2.000000e-01 : f32
    %209 = vector.broadcast %cst_150 : f32 to vector<64x8xf32>
    %210 = arith.mulf %209, %206 : vector<64x8xf32>
    %211 = arith.select %208, %206, %210 : vector<64x8xi1>, vector<64x8xf32>
    %c3_151 = arith.constant 3 : index
    %c0_152 = arith.constant 0 : index
    %c0_153 = arith.constant 0 : index
    %212 = vector.load %arg5[%c3_151, %c0_152, %c0_153] : memref<4x64x64xbf16, #tpu.memory_space<vmem>>, vector<1x64x64xbf16>
    %213 = vector.shape_cast %212 : vector<1x64x64xbf16> to vector<64x64xbf16>
    %214 = arith.truncf %211 : vector<64x8xf32> to vector<64x8xbf16>
    %cst_154 = arith.constant dense<0.000000e+00> : vector<64x8xf32>
    %215 = tpu.matmul %213, %214, %cst_154 {dimension_numbers = #tpu.dot_dimension_numbers<[1], [0], [0], [1], [0, 0, 1, 1], [], []>} : vector<64x64xbf16>, vector<64x8xbf16>, vector<64x8xf32> -> vector<64x8xf32>
    %c3_155 = arith.constant 3 : index
    %c0_156 = arith.constant 0 : index
    %c0_157 = arith.constant 0 : index
    %216 = vector.load %arg6[%c3_155, %c0_156, %c0_157] : memref<4x64x1xf32, #tpu.memory_space<vmem>>, vector<1x64x1xf32>
    %217 = vector.shape_cast %216 : vector<1x64x1xf32> to vector<64x1xf32>
    %218 = vector.broadcast %217 : vector<64x1xf32> to vector<64x8xf32>
    %219 = arith.addf %215, %218 : vector<64x8xf32>
    %cst_158 = arith.constant 0.000000e+00 : f32
    %220 = vector.broadcast %cst_158 : f32 to vector<64x8xf32>
    %221 = arith.cmpf ogt, %219, %220 : vector<64x8xf32>
    %cst_159 = arith.constant 2.000000e-01 : f32
    %222 = vector.broadcast %cst_159 : f32 to vector<64x8xf32>
    %223 = arith.mulf %222, %219 : vector<64x8xf32>
    %224 = arith.select %221, %219, %223 : vector<64x8xi1>, vector<64x8xf32>
    %c3_160 = arith.constant 3 : index
    %c0_161 = arith.constant 0 : index
    %c0_162 = arith.constant 0 : index
    %225 = vector.load %arg7[%c3_160, %c0_161, %c0_162] : memref<4x64x64xbf16, #tpu.memory_space<vmem>>, vector<1x64x64xbf16>
    %226 = vector.shape_cast %225 : vector<1x64x64xbf16> to vector<64x64xbf16>
    %227 = arith.truncf %224 : vector<64x8xf32> to vector<64x8xbf16>
    %cst_163 = arith.constant dense<0.000000e+00> : vector<64x8xf32>
    %228 = tpu.matmul %226, %227, %cst_163 {dimension_numbers = #tpu.dot_dimension_numbers<[1], [0], [0], [1], [0, 0, 1, 1], [], []>} : vector<64x64xbf16>, vector<64x8xbf16>, vector<64x8xf32> -> vector<64x8xf32>
    %c3_164 = arith.constant 3 : index
    %c0_165 = arith.constant 0 : index
    %c0_166 = arith.constant 0 : index
    %229 = vector.load %arg8[%c3_164, %c0_165, %c0_166] : memref<4x64x1xf32, #tpu.memory_space<vmem>>, vector<1x64x1xf32>
    %230 = vector.shape_cast %229 : vector<1x64x1xf32> to vector<64x1xf32>
    %231 = vector.broadcast %230 : vector<64x1xf32> to vector<64x8xf32>
    %232 = arith.addf %228, %231 : vector<64x8xf32>
    %cst_167 = arith.constant 0.000000e+00 : f32
    %233 = vector.broadcast %cst_167 : f32 to vector<64x8xf32>
    %234 = arith.cmpf ogt, %232, %233 : vector<64x8xf32>
    %cst_168 = arith.constant 2.000000e-01 : f32
    %235 = vector.broadcast %cst_168 : f32 to vector<64x8xf32>
    %236 = arith.mulf %235, %232 : vector<64x8xf32>
    %237 = arith.select %234, %232, %236 : vector<64x8xi1>, vector<64x8xf32>
    %238 = arith.truncf %237 : vector<64x8xf32> to vector<64x8xbf16>
    %c3_169 = arith.constant 3 : index
    %c0_170 = arith.constant 0 : index
    %c0_171 = arith.constant 0 : index
    %239 = vector.load %arg9[%c3_169, %c0_170, %c0_171] : memref<4x8x64xbf16, #tpu.memory_space<vmem>>, vector<1x8x64xbf16>
    %240 = vector.shape_cast %239 : vector<1x8x64xbf16> to vector<8x64xbf16>
    %cst_172 = arith.constant dense<0.000000e+00> : vector<8x8xf32>
    %241 = tpu.matmul %240, %238, %cst_172 {dimension_numbers = #tpu.dot_dimension_numbers<[1], [0], [0], [1], [0, 0, 1, 1], [], []>} : vector<8x64xbf16>, vector<64x8xbf16>, vector<8x8xf32> -> vector<8x8xf32>
    %c3_173 = arith.constant 3 : index
    %c0_174 = arith.constant 0 : index
    %c0_175 = arith.constant 0 : index
    %242 = vector.load %arg10[%c3_173, %c0_174, %c0_175] : memref<4x8x1xf32, #tpu.memory_space<vmem>>, vector<1x8x1xf32>
    %243 = vector.shape_cast %242 : vector<1x8x1xf32> to vector<8x1xf32>
    %244 = vector.broadcast %243 : vector<8x1xf32> to vector<8x8xf32>
    %245 = arith.addf %241, %244 : vector<8x8xf32>
    %c3_176 = arith.constant 3 : index
    %c0_177 = arith.constant 0 : index
    %c0_178 = arith.constant 0 : index
    %246 = vector.load %arg11[%c3_176, %c0_177, %c0_178] : memref<4x8x64xbf16, #tpu.memory_space<vmem>>, vector<1x8x64xbf16>
    %247 = vector.shape_cast %246 : vector<1x8x64xbf16> to vector<8x64xbf16>
    %cst_179 = arith.constant dense<0.000000e+00> : vector<8x8xf32>
    %248 = tpu.matmul %247, %238, %cst_179 {dimension_numbers = #tpu.dot_dimension_numbers<[1], [0], [0], [1], [0, 0, 1, 1], [], []>} : vector<8x64xbf16>, vector<64x8xbf16>, vector<8x8xf32> -> vector<8x8xf32>
    %c3_180 = arith.constant 3 : index
    %c0_181 = arith.constant 0 : index
    %c0_182 = arith.constant 0 : index
    %249 = vector.load %arg12[%c3_180, %c0_181, %c0_182] : memref<4x8x1xf32, #tpu.memory_space<vmem>>, vector<1x8x1xf32>
    %250 = vector.shape_cast %249 : vector<1x8x1xf32> to vector<8x1xf32>
    %251 = vector.broadcast %250 : vector<8x1xf32> to vector<8x8xf32>
    %252 = arith.addf %248, %251 : vector<8x8xf32>
    %253 = math.exp %245 : vector<8x8xf32>
    %254 = arith.mulf %253, %198 : vector<8x8xf32>
    %255 = arith.addf %254, %252 : vector<8x8xf32>
    %cst_183 = arith.constant dense<0.000000e+00> : vector<8xf32>
    %256 = vector.multi_reduction <add>, %245, %cst_183 [0] : vector<8x8xf32> to vector<8xf32>
    %257 = vector.shape_cast %256 : vector<8xf32> to vector<1x8xf32>
    %258 = arith.addf %194, %257 : vector<1x8xf32>
    %c4 = arith.constant 4 : index
    %c0_184 = arith.constant 0 : index
    %c0_185 = arith.constant 0 : index
    %259 = vector.load %arg13[%c4, %c0_184, %c0_185] : memref<5x8x8xf32, #tpu.memory_space<vmem>>, vector<1x8x8xf32>
    %260 = vector.shape_cast %259 : vector<1x8x8xf32> to vector<8x8xf32>
    %261 = vector.shape_cast %255 : vector<8x8xf32> to vector<1x8x8xf32>
    tpu.vector_store %arg13[%c4, %c0_184, %c0_185], %261 {strides = array<i32>} : memref<5x8x8xf32, #tpu.memory_space<vmem>>, vector<1x8x8xf32>,
    %262 = arith.mulf %255, %255 : vector<8x8xf32>
    %cst_186 = arith.constant dense<0.000000e+00> : vector<8xf32>
    %263 = vector.multi_reduction <add>, %262, %cst_186 [0] : vector<8x8xf32> to vector<8xf32>
    %264 = vector.shape_cast %263 : vector<8xf32> to vector<1x8xf32>
    %cst_187 = arith.constant 5.000000e-01 : f32
    %265 = vector.broadcast %cst_187 : f32 to vector<1x8xf32>
    %266 = arith.mulf %265, %264 : vector<1x8xf32>
    %cst_188 = arith.constant -7.35150814 : f32
    %267 = vector.broadcast %cst_188 : f32 to vector<1x8xf32>
    %268 = arith.subf %267, %266 : vector<1x8xf32>
    %269 = tpu.concatenate %258, %268 in 0 : vector<1x8xf32>, vector<1x8xf32> -> vector<2x8xf32>
    %c0_189 = arith.constant 0 : index
    %c0_190 = arith.constant 0 : index
    %270 = vector.load %arg14[%c0_189, %c0_190] : memref<2x8xf32, #tpu.memory_space<vmem>>, vector<2x8xf32>
    tpu.vector_store %arg14[%c0_189, %c0_190], %269 {strides = array<i32>} : memref<2x8xf32, #tpu.memory_space<vmem>>, vector<2x8xf32>,
    return
  }
  func.func @transform_0(%arg0: i32) -> (i32, i32) {
    %c0_i32 = arith.constant 0 : i32
    %c0_i32_0 = arith.constant 0 : i32
    return %c0_i32, %arg0 : i32, i32
  }
  func.func @transform_1(%arg0: i32) -> (i32, i32) {
    %c0_i32 = arith.constant 0 : i32
    %c0_i32_0 = arith.constant 0 : i32
    %c0_i32_1 = arith.constant 0 : i32
    return %c0_i32, %c0_i32_0 : i32, i32
  }
  func.func @transform_2(%arg0: i32) -> (i32, i32, i32) {
    %c0_i32 = arith.constant 0 : i32
    %c0_i32_0 = arith.constant 0 : i32
    %c0_i32_1 = arith.constant 0 : i32
    %c0_i32_2 = arith.constant 0 : i32
    return %c0_i32, %c0_i32_0, %c0_i32_1 : i32, i32, i32
  }
  func.func @transform_3(%arg0: i32) -> (i32, i32, i32) {
    %c0_i32 = arith.constant 0 : i32
    %c0_i32_0 = arith.constant 0 : i32
    %c0_i32_1 = arith.constant 0 : i32
    %c0_i32_2 = arith.constant 0 : i32
    return %c0_i32, %c0_i32_0, %c0_i32_1 : i32, i32, i32
  }
  func.func @transform_4(%arg0: i32) -> (i32, i32, i32) {
    %c0_i32 = arith.constant 0 : i32
    %c0_i32_0 = arith.constant 0 : i32
    %c0_i32_1 = arith.constant 0 : i32
    %c0_i32_2 = arith.constant 0 : i32
    return %c0_i32, %c0_i32_0, %c0_i32_1 : i32, i32, i32
  }
  func.func @transform_5(%arg0: i32) -> (i32, i32, i32) {
    %c0_i32 = arith.constant 0 : i32
    %c0_i32_0 = arith.constant 0 : i32
    %c0_i32_1 = arith.constant 0 : i32
    %c0_i32_2 = arith.constant 0 : i32
    return %c0_i32, %c0_i32_0, %c0_i32_1 : i32, i32, i32
  }
  func.func @transform_6(%arg0: i32) -> (i32, i32, i32) {
    %c0_i32 = arith.constant 0 : i32
    %c0_i32_0 = arith.constant 0 : i32
    %c0_i32_1 = arith.constant 0 : i32
    %c0_i32_2 = arith.constant 0 : i32
    return %c0_i32, %c0_i32_0, %c0_i32_1 : i32, i32, i32
  }
  func.func @transform_7(%arg0: i32) -> (i32, i32, i32) {
    %c0_i32 = arith.constant 0 : i32
    %c0_i32_0 = arith.constant 0 : i32
    %c0_i32_1 = arith.constant 0 : i32
    %c0_i32_2 = arith.constant 0 : i32
    return %c0_i32, %c0_i32_0, %c0_i32_1 : i32, i32, i32
  }
  func.func @transform_8(%arg0: i32) -> (i32, i32, i32) {
    %c0_i32 = arith.constant 0 : i32
    %c0_i32_0 = arith.constant 0 : i32
    %c0_i32_1 = arith.constant 0 : i32
    %c0_i32_2 = arith.constant 0 : i32
    return %c0_i32, %c0_i32_0, %c0_i32_1 : i32, i32, i32
  }
  func.func @transform_9(%arg0: i32) -> (i32, i32, i32) {
    %c0_i32 = arith.constant 0 : i32
    %c0_i32_0 = arith.constant 0 : i32
    %c0_i32_1 = arith.constant 0 : i32
    %c0_i32_2 = arith.constant 0 : i32
    return %c0_i32, %c0_i32_0, %c0_i32_1 : i32, i32, i32
  }
  func.func @transform_10(%arg0: i32) -> (i32, i32, i32) {
    %c0_i32 = arith.constant 0 : i32
    %c0_i32_0 = arith.constant 0 : i32
    %c0_i32_1 = arith.constant 0 : i32
    %c0_i32_2 = arith.constant 0 : i32
    return %c0_i32, %c0_i32_0, %c0_i32_1 : i32, i32, i32
  }
  func.func @transform_11(%arg0: i32) -> (i32, i32, i32) {
    %c0_i32 = arith.constant 0 : i32
    %c0_i32_0 = arith.constant 0 : i32
    %c0_i32_1 = arith.constant 0 : i32
    %c0_i32_2 = arith.constant 0 : i32
    return %c0_i32, %c0_i32_0, %c0_i32_1 : i32, i32, i32
  }
  func.func @transform_12(%arg0: i32) -> (i32, i32, i32) {
    %c0_i32 = arith.constant 0 : i32
    %c0_i32_0 = arith.constant 0 : i32
    %c0_i32_1 = arith.constant 0 : i32
    return %c0_i32, %c0_i32_0, %arg0 : i32, i32, i32
  }
  func.func @transform_13(%arg0: i32) -> (i32, i32) {
    %c0_i32 = arith.constant 0 : i32
    %c0_i32_0 = arith.constant 0 : i32
    return %c0_i32, %arg0 : i32, i32
  }
}

</mosaic_0001>

<bundles_post_ra>
// kernel: normalizing_flow_model_forward.1
= control target key start
LH: loop header
LB: loop body
LE: loop exit
PB: predicated region body
PF: predicated region fallthrough
CT: control target
= control target key end

     0   :  { %v3779_v0 = vmov 0   ;;  %vm46_vm0 = vcmask 64512   ;;  %vm210_vm1 = vcmask 1043456   ;;  %v3780_v54 = vmov 0.0   ;;  %s4533_s3 = inlined_call_operand.vmem [shape: f32[4,64,1], index: 3, kind: input, shape index: {}]   ;;  %s4534_s0 = inlined_call_operand.vmem [shape: f32[8,8], index: 0, kind: input, shape index: {}]   ;;  %s4535_s2 = inlined_call_operand.vmem [shape: bf16[4,64,8], index: 2, kind: input, shape index: {}]   ;;  %s4536_s12 = inlined_call_operand.vmem [shape: f32[5,8,8], index: 12, kind: output, shape index: {0}]   ;;  %s4537_s5 = inlined_call_operand.vmem [shape: f32[4,64,1], index: 5, kind: input, shape index: {}]   ;;  %s4538_s7 = inlined_call_operand.vmem [shape: f32[4,64,1], index: 7, kind: input, shape index: {}]   ;;  %s4539_s11 = inlined_call_operand.vmem [shape: f32[4,8,1], index: 11, kind: input, shape index: {}]   ;;  %s4540_s9 = inlined_call_operand.vmem [shape: f32[4,8,1], index: 9, kind: input, shape index: {}]   ;;  %s4541_s1 = inlined_call_operand.vmem [shape: f32[8,8], index: 1, kind: input, shape index: {}]   ;;  %s4542_s4 = inlined_call_operand.vmem [shape: bf16[4,64,64], index: 4, kind: input, shape index: {}]   ;;  %s4543_s6 = inlined_call_operand.vmem [shape: bf16[4,64,64], index: 6, kind: input, shape index: {}]   ;;  %s4544_s8 = inlined_call_operand.vmem [shape: bf16[4,8,64], index: 8, kind: input, shape index: {}]   ;;  %s4545_s10 = inlined_call_operand.vmem [shape: bf16[4,8,64], index: 10, kind: input, shape index: {}]   ;;  %s4546_s13 = inlined_call_operand.vmem [shape: f32[2,8], index: 13, kind: output, shape index: {1}]  }
   0x1   :  { %3721 = vset.pattern.permute.xlu1 %v3779_v0  ;;  %3720 = vset.pattern.permute.xlu0 %v3779_v0  ;;  %v136_v1 = vld [vmem:[%s4533_s3 + $0x30] sm:$0xff]  ;;  %v134_v2 = vld [vmem:[%s4533_s3 + $0x20] sm:$0xff]  ;;  %v137_v5 = vld [vmem:[%s4533_s3 + $0x38] sm:$0xff]  ;;  %vm3781_vm2 = vmmov 0   ;;  %vm383_vm3 = vcmask 523264  }
   0x2   :  { %v3861_v3 = vld [vmem:[%s4534_s0] sm:$0xff]  ;;  %170 = vperm.xlu0 %3720, %v136_v1   ;;  %160 = vperm.xlu1 %3721, %v134_v2   ;;  %v135_v6 = vld [vmem:[%s4533_s3 + $0x28] sm:$0xff]  ;;  %v133_v10 = vld [vmem:[%s4533_s3 + $0x18] sm:$0xff] }
   0x3   :  { %47 = vst.msk [vmem:[%s4536_s12] sm:$0xff] %vm46_vm0, %v3861_v3  ;;  %v129_v4 = vpack.c.bf16 %v3861_v3, %v3861_v3  ;;  %v3722_v7 = vld [vmem:[%s4535_s2] sm:$0xff]   ;;  %v3723_v9 = vld [vmem:[%s4535_s2 + $0x8] sm:$0xff]   ;;  %v3724_v11 = vld [vmem:[%s4535_s2 + $0x10] sm:$0xff]   ;;  %3429 = vmatprep.subr.mxu0 %v3780_v54  ;;  %3431 = vmatprep.mubr.msk.f32.mxu0 %vm3781_vm2, %v3780_v54 }
   0x4   :  { %3436 = vmatprep.mubr.msk.bf16.mxu1 %vm46_vm0, %v3722_v7  ;;  %v132_v12 = vld [vmem:[%s4533_s3 + $0x10] sm:$0xff]  ;;  %v131_v13 = vld [vmem:[%s4533_s3 + $0x8] sm:$0xff]  ;;  %v130_v14 = vld [vmem:[%s4533_s3] sm:$0xff]  ;;  %3430 = vmatpush3.msra.mxu0 %v3861_v3 }
   0x5   :  { %3713 = vmatprep.subr.msk.bf16.mxu1 %vm210_vm1, %v129_v4  ;;  %v212_v8 = vsel %vm210_vm1, %v129_v4, 0  ;;  %v3725_v15 = vld [vmem:[%s4535_s2 + $0x18] sm:$0xff]   ;;  %v321_v17 = vld [vmem:[%s4537_s5 + $0x30] sm:$0xff]  ;;  %v320_v18 = vld [vmem:[%s4537_s5 + $0x28] sm:$0xff] }
   0x6   :  { %3435 = vmatpush3.bf16.msra.mxu1 %v212_v8  ;;  %175 = vperm.xlu0 %3720, %v137_v5   ;;  %v322_v16 = vld [vmem:[%s4537_s5 + $0x38] sm:$0xff]  ;;  %v319_v19 = vld [vmem:[%s4537_s5 + $0x20] sm:$0xff]  ;;  %v317_v21 = vld [vmem:[%s4537_s5 + $0x10] sm:$0xff] }
   0x7   :  { %165 = vperm.xlu1 %3721, %v135_v6   ;;  %v318_v20 = vld [vmem:[%s4537_s5 + $0x18] sm:$0xff]  ;;  %v316_v22 = vld [vmem:[%s4537_s5 + $0x8] sm:$0xff]  ;;  %v315_v23 = vld [vmem:[%s4537_s5] sm:$0xff] }
   0x8   :  { %v504_v24 = vld [vmem:[%s4538_s7 + $0x38] sm:$0xff]  ;;  %v503_v25 = vld [vmem:[%s4538_s7 + $0x30] sm:$0xff]  ;;  %v502_v26 = vld [vmem:[%s4538_s7 + $0x28] sm:$0xff] }
   0x9   :  { %3437 = vmatmul.mubr.msk.bf16.vlgmr.msra.gmra.mxu1 %vm46_vm0, %v3723_v9  ;;  %v501_v27 = vld [vmem:[%s4538_s7 + $0x20] sm:$0xff]  ;;  %v500_v28 = vld [vmem:[%s4538_s7 + $0x18] sm:$0xff]  ;;  %v499_v29 = vld [vmem:[%s4538_s7 + $0x10] sm:$0xff] }
   0xa   :  { %3440 = vmatprep.mubr.msk.bf16.mxu1 %vm46_vm0, %v3724_v11  ;;  %150 = vperm.xlu0 %3720, %v132_v12   ;;  %v498_v30 = vld [vmem:[%s4538_s7 + $0x8] sm:$0xff]  ;;  %v497_v31 = vld [vmem:[%s4538_s7] sm:$0xff]  ;;  %v3073_v34 = vld [vmem:[%s4533_s3 + $0x78] sm:$0xff] }
   0xb   :  { %155 = vperm.xlu1 %3721, %v133_v10   ;;  %v721_v32 = vld [vmem:[%s4539_s11] sm:$0xff]  ;;  %v3072_v35 = vld [vmem:[%s4533_s3 + $0x70] sm:$0xff]  ;;  %v3071_v36 = vld [vmem:[%s4533_s3 + $0x68] sm:$0xff] }
   0xc   :  { %v671_v33 = vld [vmem:[%s4540_s9] sm:$0xff]  ;;  %v3069_v38 = vld [vmem:[%s4533_s3 + $0x58] sm:$0xff]  ;;  %v3068_v39 = vld [vmem:[%s4533_s3 + $0x50] sm:$0xff] }
   0xd   :  { %v3070_v37 = vld [vmem:[%s4533_s3 + $0x60] sm:$0xff]  ;;  %v3067_v40 = vld [vmem:[%s4533_s3 + $0x48] sm:$0xff]  ;;  %v3097_v42 = vld [vmem:[%s4537_s5 + $0x78] sm:$0xff] }
   0xe   :  { %140 = vperm.xlu0 %3720, %v130_v14   ;;  %v3066_v41 = vld [vmem:[%s4533_s3 + $0x40] sm:$0xff]  ;;  %v3096_v43 = vld [vmem:[%s4537_s5 + $0x70] sm:$0xff]  ;;  %v3095_v44 = vld [vmem:[%s4537_s5 + $0x68] sm:$0xff] }
   0xf   :  { %145 = vperm.xlu1 %3721, %v131_v13   ;;  %v3094_v45 = vld [vmem:[%s4537_s5 + $0x60] sm:$0xff]  ;;  %v3093_v46 = vld [vmem:[%s4537_s5 + $0x58] sm:$0xff]  ;;  %v3092_v47 = vld [vmem:[%s4537_s5 + $0x50] sm:$0xff] }
  0x10   :  { %v3091_v48 = vld [vmem:[%s4537_s5 + $0x48] sm:$0xff]  ;;  %v3090_v49 = vld [vmem:[%s4537_s5 + $0x40] sm:$0xff]  ;;  %v3121_v50 = vld [vmem:[%s4538_s7 + $0x78] sm:$0xff] }
  0x11   :  { %3441 = vmatmul.mubr.msk.bf16.gmra.mxu1 %vm46_vm0, %v3725_v15  ;;  %v3120_v51 = vld [vmem:[%s4538_s7 + $0x70] sm:$0xff]  ;;  %v3119_v52 = vld [vmem:[%s4538_s7 + $0x68] sm:$0xff]  ;;  %v3118_v53 = vld [vmem:[%s4538_s7 + $0x60] sm:$0xff] }
  0x12   :  { %355 = vperm.xlu0 %3720, %v321_v17   ;;  %v4024_v55 = vld [vmem:[%s4541_s1] sm:$0xff]  ;;  %v3117_v56 = vld [vmem:[%s4538_s7 + $0x58] sm:$0xff]  ;;  %v3116_v57 = vld [vmem:[%s4538_s7 + $0x50] sm:$0xff] }
  0x13   :  { %360 = vperm.xlu1 %3721, %v322_v16   ;;  %3432 = vmatmul.mubr.msk.f32.vlgmr.msra.gmra.mxu0 %vm46_vm0, %v4024_v55  ;;  %v3115_v58 = vld [vmem:[%s4538_s7 + $0x48] sm:$0xff]  ;;  %v3114_v59 = vld [vmem:[%s4538_s7 + $0x40] sm:$0xff]  ;;  %v3153_v62 = vld [vmem:[%s4533_s3 + $0xb8] sm:$0xff] }
  0x14   :  { %v3134_v60 = vld [vmem:[%s4539_s11 + $0x8] sm:$0xff]  ;;  %v3152_v63 = vld [vmem:[%s4533_s3 + $0xb0] sm:$0xff]  ;;  %v3726_v1 = vld [vmem:[%s4542_s4] sm:$0xff]  }
  0x15   :  { %v3131_v61 = vld [vmem:[%s4540_s9 + $0x8] sm:$0xff]  ;;  %v3150_v2 = vld [vmem:[%s4533_s3 + $0xa0] sm:$0xff]  ;;  %3452 = vmatprep.mubr.msk.bf16.mxu0 %vm383_vm3, %v3726_v1  ;;  %v3149_v3 = vld [vmem:[%s4533_s3 + $0x98] sm:$0xff] }
  0x16   :  { %345 = vperm.xlu0 %3720, %v319_v19   ;;  %v3151_v0 = vld [vmem:[%s4533_s3 + $0xa8] sm:$0xff]  ;;  %v3148_v4 = vld [vmem:[%s4533_s3 + $0x90] sm:$0xff]  ;;  %v3146_v6 = vld [vmem:[%s4533_s3 + $0x80] sm:$0xff] }
  0x17   :  { %350 = vperm.xlu1 %3721, %v320_v18   ;;  %v3147_v5 = vld [vmem:[%s4533_s3 + $0x88] sm:$0xff]  ;;  %v3177_v7 = vld [vmem:[%s4537_s5 + $0xb8] sm:$0xff]  ;;  %v3176_v8 = vld [vmem:[%s4537_s5 + $0xb0] sm:$0xff] }
  0x18   :  { %v3175_v9 = vld [vmem:[%s4537_s5 + $0xa8] sm:$0xff]  ;;  %v3174_v10 = vld [vmem:[%s4537_s5 + $0xa0] sm:$0xff]  ;;  %v3173_v11 = vld [vmem:[%s4537_s5 + $0x98] sm:$0xff] }
  0x19   :  { %v3172_v12 = vld [vmem:[%s4537_s5 + $0x90] sm:$0xff]  ;;  %v3171_v13 = vld [vmem:[%s4537_s5 + $0x88] sm:$0xff]  ;;  %v3170_v14 = vld [vmem:[%s4537_s5 + $0x80] sm:$0xff] }
  0x1a   :  { %335 = vperm.xlu0 %3720, %v317_v21   ;;  %v3201_v15 = vld [vmem:[%s4538_s7 + $0xb8] sm:$0xff]  ;;  %v3200_v16 = vld [vmem:[%s4538_s7 + $0xb0] sm:$0xff]  ;;  %v3199_v17 = vld [vmem:[%s4538_s7 + $0xa8] sm:$0xff] }
  0x1b   :  { %340 = vperm.xlu1 %3721, %v318_v20   ;;  %v3198_v18 = vld [vmem:[%s4538_s7 + $0xa0] sm:$0xff]  ;;  %v3197_v19 = vld [vmem:[%s4538_s7 + $0x98] sm:$0xff]  ;;  %v3196_v20 = vld [vmem:[%s4538_s7 + $0x90] sm:$0xff] }
  0x1c   :  { %v3195_v21 = vld [vmem:[%s4538_s7 + $0x88] sm:$0xff] }
  0x1e   :  { %325 = vperm.xlu0 %3720, %v315_v23   ;;  %v3214_v23 = vld [vmem:[%s4539_s11 + $0x10] sm:$0xff] }
  0x1f   :  { %330 = vperm.xlu1 %3721, %v316_v22   ;;  %v3194_v22 = vld [vmem:[%s4538_s7 + $0x80] sm:$0xff] }
  0x22   :  { %537 = vperm.xlu0 %3720, %v503_v25   ;;  %v3233_v25 = vld [vmem:[%s4533_s3 + $0xf8] sm:$0xff] }
  0x23   :  { %542 = vperm.xlu1 %3721, %v504_v24   ;;  %v3211_v24 = vld [vmem:[%s4540_s9 + $0x10] sm:$0xff] }
  0x26   :  { %527 = vperm.xlu0 %3720, %v501_v27   ;;  %v3231_v27 = vld [vmem:[%s4533_s3 + $0xe8] sm:$0xff] }
  0x27   :  { %532 = vperm.xlu1 %3721, %v502_v26   ;;  %v3232_v26 = vld [vmem:[%s4533_s3 + $0xf0] sm:$0xff] }
  0x2a   :  { %517 = vperm.xlu0 %3720, %v499_v29   ;;  %v3229_v29 = vld [vmem:[%s4533_s3 + $0xd8] sm:$0xff] }
  0x2b   :  { %522 = vperm.xlu1 %3721, %v500_v28   ;;  %v3230_v28 = vld [vmem:[%s4533_s3 + $0xe0] sm:$0xff] }
  0x2e   :  { %507 = vperm.xlu0 %3720, %v497_v31   ;;  %v3227_v31 = vld [vmem:[%s4533_s3 + $0xc8] sm:$0xff] }
  0x2f   :  { %512 = vperm.xlu1 %3721, %v498_v30   ;;  %v3228_v30 = vld [vmem:[%s4533_s3 + $0xd0] sm:$0xff] }
  0x32   :  { %674 = vperm.xlu0 %3720, %v671_v33   ;;  %v3257_v33 = vld [vmem:[%s4537_s5 + $0xf8] sm:$0xff] }
  0x33   :  { %724 = vperm.xlu1 %3721, %v721_v32   ;;  %v3226_v32 = vld [vmem:[%s4533_s3 + $0xc0] sm:$0xff] }
  0x36   :  { %905 = vperm.xlu0 %3720, %v3072_v35   ;;  %v3255_v35 = vld [vmem:[%s4537_s5 + $0xe8] sm:$0xff] }
  0x37   :  { %910 = vperm.xlu1 %3721, %v3073_v34   ;;  %v3256_v34 = vld [vmem:[%s4537_s5 + $0xf0] sm:$0xff] }
  0x3a   :  { %895 = vperm.xlu0 %3720, %v3070_v37   ;;  %v3253_v37 = vld [vmem:[%s4537_s5 + $0xd8] sm:$0xff] }
  0x3b   :  { %900 = vperm.xlu1 %3721, %v3071_v36   ;;  %v3254_v36 = vld [vmem:[%s4537_s5 + $0xe0] sm:$0xff] }
  0x3e   :  { %885 = vperm.xlu0 %3720, %v3068_v39   ;;  %v3251_v39 = vld [vmem:[%s4537_s5 + $0xc8] sm:$0xff] }
  0x3f   :  { %890 = vperm.xlu1 %3721, %v3069_v38   ;;  %v3252_v38 = vld [vmem:[%s4537_s5 + $0xd0] sm:$0xff] }
  0x42   :  { %875 = vperm.xlu0 %3720, %v3066_v41   ;;  %v3281_v41 = vld [vmem:[%s4538_s7 + $0xf8] sm:$0xff] }
  0x43   :  { %880 = vperm.xlu1 %3721, %v3067_v40   ;;  %v3250_v40 = vld [vmem:[%s4537_s5 + $0xc0] sm:$0xff] }
  0x46   :  { %1091 = vperm.xlu0 %3720, %v3096_v43   ;;  %v3279_v43 = vld [vmem:[%s4538_s7 + $0xe8] sm:$0xff] }
  0x47   :  { %1096 = vperm.xlu1 %3721, %v3097_v42   ;;  %v3280_v42 = vld [vmem:[%s4538_s7 + $0xf0] sm:$0xff] }
  0x4a   :  { %1081 = vperm.xlu0 %3720, %v3094_v45  }
  0x4b   :  { %1086 = vperm.xlu1 %3721, %v3095_v44   ;;  %v3278_v44 = vld [vmem:[%s4538_s7 + $0xe0] sm:$0xff] }
  0x4e   :  { %1071 = vperm.xlu0 %3720, %v3092_v47   ;;  %v3277_v47 = vld [vmem:[%s4538_s7 + $0xd8] sm:$0xff] }
  0x4f   :  { %1076 = vperm.xlu1 %3721, %v3093_v46  }
  0x52   :  { %1061 = vperm.xlu0 %3720, %v3090_v49  }
  0x53   :  { %1066 = vperm.xlu1 %3721, %v3091_v48   ;;  %v3276_v48 = vld [vmem:[%s4538_s7 + $0xd0] sm:$0xff] }
  0x56   :  { %1274 = vperm.xlu0 %3720, %v3120_v51   ;;  %v3274_v51 = vld [vmem:[%s4538_s7 + $0xc0] sm:$0xff] }
  0x57   :  { %1279 = vperm.xlu1 %3721, %v3121_v50   ;;  %v3275_v50 = vld [vmem:[%s4538_s7 + $0xc8] sm:$0xff] }
  0x5a   :  { %1264 = vperm.xlu0 %3720, %v3118_v53  }
  0x5b   :  { %1269 = vperm.xlu1 %3721, %v3119_v52  }
  0x5e   :  { %1254 = vperm.xlu0 %3720, %v3116_v57   ;;  %v3294_v57 = vld [vmem:[%s4539_s11 + $0x18] sm:$0xff] }
  0x5f   :  { %1259 = vperm.xlu1 %3721, %v3117_v56  }
  0x62   :  { %1244 = vperm.xlu0 %3720, %v3114_v59  }
  0x63   :  { %1249 = vperm.xlu1 %3721, %v3115_v58   ;;  %v3291_v58 = vld [vmem:[%s4540_s9 + $0x18] sm:$0xff] }
  0x66   :  { %1413 = vperm.xlu0 %3720, %v3131_v61  }
  0x67   :  { %1465 = vperm.xlu1 %3721, %v3134_v60  }
  0x6a   :  { %1646 = vperm.xlu0 %3720, %v3152_v63  }
  0x6b   :  { %1651 = vperm.xlu1 %3721, %v3153_v62  }
  0x6e   :  { %1636 = vperm.xlu0 %3720, %v3150_v2  }
  0x6f   :  { %1641 = vperm.xlu1 %3721, %v3151_v0  }
  0x72   :  { %1626 = vperm.xlu0 %3720, %v3148_v4  }
  0x73   :  { %1631 = vperm.xlu1 %3721, %v3149_v3  }
  0x76   :  { %1616 = vperm.xlu0 %3720, %v3146_v6  }
  0x77   :  { %1621 = vperm.xlu1 %3721, %v3147_v5  }
  0x7a   :  { %1832 = vperm.xlu0 %3720, %v3176_v8  }
  0x7b   :  { %1837 = vperm.xlu1 %3721, %v3177_v7  }
  0x7d   :  { %v161_v45 = vpop.permute.xlu1 %160  ;;  %v171_v46 = vpop.permute.xlu0 %170 }
  0x7e   :  { %1822 = vperm.xlu0 %3720, %v3174_v10  }
  0x7f   :  { %1827 = vperm.xlu1 %3721, %v3175_v9  }
  0x81   :  { %v176_v52 = vpop.permute.xlu0 %175 }
  0x82   :  { %1812 = vperm.xlu0 %3720, %v3172_v12   ;;  %v166_v49 = vpop.permute.xlu1 %165 }
  0x83   :  { %1817 = vperm.xlu1 %3721, %v3173_v11  }
  0x85   :  { %v151_v61 = vpop.permute.xlu0 %150 }
  0x86   :  { %1802 = vperm.xlu0 %3720, %v3170_v14   ;;  %v156_v60 = vpop.permute.xlu1 %155 }
  0x87   :  { %1807 = vperm.xlu1 %3721, %v3171_v13  }
  0x8a   :  { %2015 = vperm.xlu0 %3720, %v3200_v16   ;;  %v146_v9 = vpop.permute.xlu1 %145 }
  0x8b   :  { %2020 = vperm.xlu1 %3721, %v3201_v15  }
  0x8e   :  { %2005 = vperm.xlu0 %3720, %v3198_v18   ;;  %v141_v18 = vpop.permute.xlu0 %140 }
  0x8f   :  { %2010 = vperm.xlu1 %3721, %v3199_v17  }
  0x92   :  { %1995 = vperm.xlu0 %3720, %v3196_v20  }
  0x93   :  { %2000 = vperm.xlu1 %3721, %v3197_v19  }
  0x96   :  { %1985 = vperm.xlu0 %3720, %v3194_v22  }
  0x97   :  { %1990 = vperm.xlu1 %3721, %v3195_v21  }
  0x9a   :  { %2154 = vperm.xlu0 %3720, %v3211_v24  }
  0x9b   :  { %2206 = vperm.xlu1 %3721, %v3214_v23  }
  0x9e   :  { %2387 = vperm.xlu0 %3720, %v3232_v26  }
  0x9f   :  { %2392 = vperm.xlu1 %3721, %v3233_v25  }
  0xa2   :  { %2377 = vperm.xlu0 %3720, %v3230_v28  }
  0xa3   :  { %2382 = vperm.xlu1 %3721, %v3231_v27  }
  0xa6   :  { %2367 = vperm.xlu0 %3720, %v3228_v30  }
  0xa7   :  { %2372 = vperm.xlu1 %3721, %v3229_v29  }
  0xaa   :  { %2357 = vperm.xlu0 %3720, %v3226_v32  }
  0xab   :  { %2362 = vperm.xlu1 %3721, %v3227_v31  }
  0xae   :  { %2573 = vperm.xlu0 %3720, %v3256_v34   ;;  %v3728_v34 = vld [vmem:[%s4542_s4 + $0x10] sm:$0xff]  }
  0xaf   :  { %2578 = vperm.xlu1 %3721, %v3257_v33   ;;  %v3727_v33 = vld [vmem:[%s4542_s4 + $0x8] sm:$0xff]  }
  0xb2   :  { %2563 = vperm.xlu0 %3720, %v3254_v36  }
  0xb3   :  { %2568 = vperm.xlu1 %3721, %v3255_v35   ;;  %v3729_v35 = vld [vmem:[%s4542_s4 + $0x18] sm:$0xff]  }
  0xb6   :  { %2553 = vperm.xlu0 %3720, %v3252_v38   ;;  %v3730_v38 = vld [vmem:[%s4543_s6] sm:$0xff]  }
  0xb7   :  { %2558 = vperm.xlu1 %3721, %v3253_v37   ;;  %3468 = vmatprep.mubr.msk.bf16.mxu1 %vm383_vm3, %v3730_v38 }
  0xba   :  { %2543 = vperm.xlu0 %3720, %v3250_v40   ;;  %v356_v40 = vpop.permute.xlu0 %355 }
  0xbb   :  { %2548 = vperm.xlu1 %3721, %v3251_v39   ;;  %v361_v39 = vpop.permute.xlu1 %360 }
  0xbe   :  { %2756 = vperm.xlu0 %3720, %v3280_v42  }
  0xbf   :  { %2761 = vperm.xlu1 %3721, %v3281_v41  }
  0xc2   :  { %2746 = vperm.xlu0 %3720, %v3278_v44  }
  0xc3   :  { %2751 = vperm.xlu1 %3721, %v3279_v43   ;;  %v351_v43 = vpop.permute.xlu1 %350 }
  0xc6   :  { %2736 = vperm.xlu0 %3720, %v3276_v48  }
  0xc7   :  { %2741 = vperm.xlu1 %3721, %v3277_v47   ;;  %v341_v48 = vpop.permute.xlu1 %340 }
  0xc9   :  { %v3438_v53 = vpop.f32.mrf.mxu1 }
  0xca   :  { %2726 = vperm.xlu0 %3720, %v3274_v51   ;;  %v257_v7 = vadd.f32 %v3438_v53, %v151_v61 }
  0xcb   :  { %2731 = vperm.xlu1 %3721, %v3275_v50   ;;  %v248_v56 = vpop.f32.mrf.mxu1  ;;  %v331_v61 = vpop.permute.xlu1 %330 }
  0xcc   :  { %v289_v20 = vmul.f32 0.2, %v257_v7  ;;  %v249_v21 = vadd.f32 %v248_v56, %v141_v18  ;;  %vm281_vm9 = vcmp.gt.f32.partialorder %v257_v7, 0.0 }
  0xcd   :  { %v3439_v59 = vpop.f32.mrf.mxu1 }
  0xce   :  { %2895 = vperm.xlu0 %3720, %v3291_v58   ;;  %v260_v3 = vadd.f32 %v3439_v59, %v156_v60  ;;  %v287_v27 = vmul.f32 0.2, %v249_v21  ;;  %v297_v28 = vsel %vm281_vm9, %v257_v7, %v289_v20  ;;  %vm279_vm11 = vcmp.gt.f32.partialorder %v249_v21, 0.0 }
  0xcf   :  { %2947 = vperm.xlu1 %3721, %v3294_v57   ;;  %v251_v62 = vpop.f32.mrf.mxu1 }
  0xd0   :  { %v290_v13 = vmul.f32 0.2, %v260_v3  ;;  %v252_v14 = vadd.f32 %v251_v62, %v146_v9  ;;  %vm282_vm8 = vcmp.gt.f32.partialorder %v260_v3, 0.0  ;;  %v295_v31 = vsel %vm279_vm11, %v249_v21, %v287_v27  ;;  %v3731_v21 = vld [vmem:[%s4543_s6 + $0x8] sm:$0xff]  }
  0xd1   :  { %v3442_v63 = vpop.f32.mrf.mxu1 }
  0xd2   :  { %v273_v0 = vadd.f32 %v3442_v63, %v171_v46  ;;  %v288_v25 = vmul.f32 0.2, %v252_v14  ;;  %v298_v26 = vsel %vm282_vm8, %v260_v3, %v290_v13  ;;  %vm280_vm10 = vcmp.gt.f32.partialorder %v252_v14, 0.0 }
  0xd3   :  { %v264_v1 = vpop.f32.mrf.mxu1  ;;  %v312_v29 = vpack.c.bf16 %v298_v26, %v297_v28  ;;  %v4224_v36 = vpop.f32.mrf.mxu0 }
  0xd4   :  { %v265_v2 = vadd.f32 %v264_v1, %v161_v45  ;;  %v293_v5 = vmul.f32 0.2, %v273_v0  ;;  %vm285_vm4 = vcmp.gt.f32.partialorder %v273_v0, 0.0  ;;  %v296_v30 = vsel %vm280_vm10, %v252_v14, %v288_v25  ;;  %v346_v45 = vpop.permute.xlu0 %345 }
  0xd5   :  { %v3443_v4 = vpop.f32.mrf.mxu1  ;;  %v311_v32 = vpack.c.bf16 %v296_v30, %v295_v31  ;;  %v3433_v37 = vpop.f32.mrf.mxu0 }
  0xd6   :  { %v276_v6 = vadd.f32 %v3443_v4, %v176_v52  ;;  %v291_v10 = vmul.f32 0.2, %v265_v2  ;;  %vm283_vm6 = vcmp.gt.f32.partialorder %v265_v2, 0.0  ;;  %v301_v16 = vsel %vm285_vm4, %v273_v0, %v293_v5 }
  0xd7   :  { %v267_v8 = vpop.f32.mrf.mxu1 }
  0xd8   :  { %vm286_vm5 = vcmp.gt.f32.partialorder %v276_v6, 0.0  ;;  %v294_v11 = vmul.f32 0.2, %v276_v6  ;;  %v268_v12 = vadd.f32 %v267_v8, %v166_v49  ;;  %v299_v22 = vsel %vm283_vm6, %v265_v2, %v291_v10  ;;  %v336_v52 = vpop.permute.xlu0 %335 }
  0xda   :  { %vm284_vm7 = vcmp.gt.f32.partialorder %v268_v12, 0.0  ;;  %v292_v15 = vmul.f32 0.2, %v268_v12  ;;  %v302_v17 = vsel %vm286_vm5, %v276_v6, %v294_v11 }
  0xdb   :  { %v314_v19 = vpack.c.bf16 %v302_v17, %v301_v16 }
  0xdc   :  { %v300_v23 = vsel %vm284_vm7, %v268_v12, %v292_v15  ;;  %v326_v6 = vpop.permute.xlu0 %325 }
  0xdd   :  { %3444 = vmatprep.subr.bf16.mxu0 %v314_v19  ;;  %v313_v24 = vpack.c.bf16 %v300_v23, %v299_v22  ;;  %v3732_v22 = vld [vmem:[%s4543_s6 + $0x10] sm:$0xff]   ;;  %v3733_v23 = vld [vmem:[%s4543_s6 + $0x18] sm:$0xff]  }
  0xde   :  { %3445 = vmatpush3.bf16.msra.mxu0 %v314_v19 }
  0xdf   :  { %3446 = vmatprep.subr.bf16.mxu0 %v313_v24 }
  0xe0   :  { %v538_v26 = vpop.permute.xlu0 %537 }
  0xe2   :  { %3447 = vmatpush3.bf16.msra.mxu0 %v313_v24  ;;  %v543_v24 = vpop.permute.xlu1 %542 }
  0xe3   :  { %3448 = vmatprep.subr.bf16.mxu0 %v312_v29 }
  0xe4   :  { %v528_v31 = vpop.permute.xlu0 %527 }
  0xe6   :  { %3449 = vmatpush3.bf16.msra.mxu0 %v312_v29  ;;  %v533_v29 = vpop.permute.xlu1 %532 }
  0xe7   :  { %3450 = vmatprep.subr.bf16.mxu0 %v311_v32 }
  0xea   :  { %3451 = vmatpush3.bf16.msra.mxu0 %v311_v32 }
  0xeb   :  { %3476 = vmatprep.subr.bf16.mxu0 %v3780_v54 }
  0xed   :  { %3453 = vmatmul.mubr.msk.bf16.vlgmr.msra.gmra.mxu0 %vm383_vm3, %v3727_v33 }
  0xee   :  { %3456 = vmatprep.mubr.msk.bf16.mxu0 %vm383_vm3, %v3728_v34 }
  0xf5   :  { %3457 = vmatmul.mubr.msk.bf16.gmra.mxu0 %vm383_vm3, %v3729_v35  ;;  %v523_v35 = vpop.permute.xlu1 %522 }
  0xf6   :  { %3484 = vmatprep.mubr.msk.bf16.mxu0 %vm3781_vm2, %v3780_v54 }
 0x1ad   :  { %v3454_v41 = vpop.f32.mrf.mxu0 }
 0x1ae   :  { %v439_v59 = vadd.f32 %v3454_v41, %v336_v52  ;;  %v518_v41 = vpop.permute.xlu0 %517 }
 0x1af   :  { %v430_v42 = vpop.f32.mrf.mxu0 }
 0x1b0   :  { %v471_v8 = vmul.f32 0.2, %v439_v59  ;;  %v431_v9 = vadd.f32 %v430_v42, %v326_v6  ;;  %vm463_vm5 = vcmp.gt.f32.partialorder %v439_v59, 0.0 }
 0x1b1   :  { %v3455_v44 = vpop.f32.mrf.mxu0 }
 0x1b2   :  { %v442_v53 = vadd.f32 %v3455_v44, %v341_v48  ;;  %v469_v15 = vmul.f32 0.2, %v431_v9  ;;  %v479_v16 = vsel %vm463_vm5, %v439_v59, %v471_v8  ;;  %vm461_vm7 = vcmp.gt.f32.partialorder %v431_v9, 0.0  ;;  %v720_v8 = vld [vmem:[%s4545_s10] sm:$0xf] }
 0x1b3   :  { %v433_v46 = vpop.f32.mrf.mxu0 }
 0x1b4   :  { %v472_v1 = vmul.f32 0.2, %v442_v53  ;;  %v434_v2 = vadd.f32 %v433_v46, %v331_v61  ;;  %vm464_vm4 = vcmp.gt.f32.partialorder %v442_v53, 0.0  ;;  %v477_v19 = vsel %vm461_vm7, %v431_v9, %v469_v15  ;;  %v3734_v9 = vld [vmem:[%s4535_s2 + $0x20] sm:$0xff]  }
 0x1b5   :  { %v3458_v47 = vpop.f32.mrf.mxu0 }
 0x1b6   :  { %v455_v49 = vadd.f32 %v3458_v47, %v356_v40  ;;  %v470_v13 = vmul.f32 0.2, %v434_v2  ;;  %v480_v14 = vsel %vm464_vm4, %v442_v53, %v472_v1  ;;  %vm462_vm6 = vcmp.gt.f32.partialorder %v434_v2, 0.0 }
 0x1b7   :  { %v446_v50 = vpop.f32.mrf.mxu0  ;;  %v494_v17 = vpack.c.bf16 %v480_v14, %v479_v16 }
 0x1b8   :  { %v447_v51 = vadd.f32 %v446_v50, %v346_v45  ;;  %v475_v57 = vmul.f32 0.2, %v455_v49  ;;  %vm467_vm12 = vcmp.gt.f32.partialorder %v455_v49, 0.0  ;;  %v478_v18 = vsel %vm462_vm6, %v434_v2, %v470_v13 }
 0x1b9   :  { %v3459_v56 = vpop.f32.mrf.mxu0  ;;  %v493_v20 = vpack.c.bf16 %v478_v18, %v477_v19 }
 0x1ba   :  { %v458_v58 = vadd.f32 %v3459_v56, %v361_v39  ;;  %v473_v62 = vmul.f32 0.2, %v447_v51  ;;  %vm465_vm14 = vcmp.gt.f32.partialorder %v447_v51, 0.0  ;;  %v483_v4 = vsel %vm467_vm12, %v455_v49, %v475_v57 }
 0x1bb   :  { %v449_v60 = vpop.f32.mrf.mxu0 }
 0x1bc   :  { %vm468_vm13 = vcmp.gt.f32.partialorder %v458_v58, 0.0  ;;  %v476_v63 = vmul.f32 0.2, %v458_v58  ;;  %v450_v0 = vadd.f32 %v449_v60, %v351_v43  ;;  %v481_v10 = vsel %vm465_vm14, %v447_v51, %v473_v62  ;;  %v513_v51 = vpop.permute.xlu1 %512 }
 0x1be   :  { %vm466_vm15 = vcmp.gt.f32.partialorder %v450_v0, 0.0  ;;  %v474_v3 = vmul.f32 0.2, %v450_v0  ;;  %v484_v5 = vsel %vm468_vm13, %v458_v58, %v476_v63  ;;  %v508_v58 = vpop.permute.xlu0 %507 }
 0x1bf   :  { %v496_v7 = vpack.c.bf16 %v484_v5, %v483_v4 }
 0x1c0   :  { %v482_v11 = vsel %vm466_vm15, %v450_v0, %v474_v3 }
 0x1c1   :  { %3460 = vmatprep.subr.bf16.mxu1 %v496_v7  ;;  %v495_v12 = vpack.c.bf16 %v482_v11, %v481_v10 }
 0x1c2   :  { %3461 = vmatpush3.bf16.msra.mxu1 %v496_v7  ;;  %v670_v7 = vld [vmem:[%s4544_s8] sm:$0xf]  ;;  %v675_v10 = vpop.permute.xlu0 %674 }
 0x1c3   :  { %3462 = vmatprep.subr.bf16.mxu1 %v495_v12 }
 0x1c6   :  { %3463 = vmatpush3.bf16.msra.mxu1 %v495_v12 }
 0x1c7   :  { %3464 = vmatprep.subr.bf16.mxu1 %v494_v17 }
 0x1ca   :  { %3465 = vmatpush3.bf16.msra.mxu1 %v494_v17 }
 0x1cb   :  { %3466 = vmatprep.subr.bf16.mxu1 %v493_v20 }
 0x1ce   :  { %3467 = vmatpush3.bf16.msra.mxu1 %v493_v20 }
 0x1cf   :  { %3488 = vmatprep.subr.bf16.mxu1 %v3780_v54 }
 0x1d1   :  { %3469 = vmatmul.mubr.msk.bf16.vlgmr.msra.gmra.mxu1 %vm383_vm3, %v3731_v21 }
 0x1d2   :  { %3472 = vmatprep.mubr.msk.bf16.mxu1 %vm383_vm3, %v3732_v22  ;;  %v725_v22 = vpop.permute.xlu1 %724 }
 0x1d9   :  { %3473 = vmatmul.mubr.msk.bf16.gmra.mxu1 %vm383_vm3, %v3733_v23 }
 0x1da   :  { %3496 = vmatprep.mubr.msk.bf16.mxu1 %vm3781_vm2, %v3780_v54 }
 0x291   :  { %v3470_v25 = vpop.f32.mrf.mxu1 }
 0x292   :  { %v620_v46 = vadd.f32 %v3470_v25, %v518_v41 }
 0x293   :  { %v611_v27 = vpop.f32.mrf.mxu1 }
 0x294   :  { %v652_v59 = vmul.f32 0.2, %v620_v46  ;;  %v612_v60 = vadd.f32 %v611_v27, %v508_v58  ;;  %vm644_vm13 = vcmp.gt.f32.partialorder %v620_v46, 0.0 }
 0x295   :  { %v3471_v28 = vpop.f32.mrf.mxu1 }
 0x296   :  { %v623_v43 = vadd.f32 %v3471_v28, %v523_v35  ;;  %v660_v1 = vsel %vm644_vm13, %v620_v46, %v652_v59  ;;  %v650_v2 = vmul.f32 0.2, %v612_v60  ;;  %vm642_vm15 = vcmp.gt.f32.partialorder %v612_v60, 0.0  ;;  %v3735_v28 = vld [vmem:[%s4535_s2 + $0x28] sm:$0xff]  }
 0x297   :  { %v614_v30 = vpop.f32.mrf.mxu1 }
 0x298   :  { %v653_v53 = vmul.f32 0.2, %v623_v43  ;;  %v615_v56 = vadd.f32 %v614_v30, %v513_v51  ;;  %vm645_vm12 = vcmp.gt.f32.partialorder %v623_v43, 0.0  ;;  %v658_v5 = vsel %vm642_vm15, %v612_v60, %v650_v2 }
 0x299   :  { %v3474_v32 = vpop.f32.mrf.mxu1 }
 0x29a   :  { %v636_v33 = vadd.f32 %v3474_v32, %v538_v26  ;;  %v661_v63 = vsel %vm645_vm12, %v623_v43, %v653_v53  ;;  %v651_v0 = vmul.f32 0.2, %v615_v56  ;;  %vm643_vm14 = vcmp.gt.f32.partialorder %v615_v56, 0.0 }
 0x29b   :  { %v627_v34 = vpop.f32.mrf.mxu1  ;;  %v667_v3 = vpack.c.bf16 %v661_v63, %v660_v1 }
 0x29c   :  { %v656_v37 = vmul.f32 0.2, %v636_v33  ;;  %vm648_vm8 = vcmp.gt.f32.partialorder %v636_v33, 0.0  ;;  %v628_v39 = vadd.f32 %v627_v34, %v528_v31  ;;  %v659_v4 = vsel %vm643_vm14, %v615_v56, %v651_v0  ;;  %v911_v31 = vpop.permute.xlu1 %910 }
 0x29d   :  { %v3475_v38 = vpop.f32.mrf.mxu1  ;;  %v666_v6 = vpack.c.bf16 %v659_v4, %v658_v5 }
 0x29e   :  { %v639_v40 = vadd.f32 %v3475_v38, %v543_v24  ;;  %v664_v47 = vsel %vm648_vm8, %v636_v33, %v656_v37  ;;  %v654_v48 = vmul.f32 0.2, %v628_v39  ;;  %vm646_vm11 = vcmp.gt.f32.partialorder %v628_v39, 0.0  ;;  %v906_v33 = vpop.permute.xlu0 %905 }
 0x29f   :  { %v630_v42 = vpop.f32.mrf.mxu1 }
 0x2a0   :  { %vm649_vm9 = vcmp.gt.f32.partialorder %v639_v40, 0.0  ;;  %v657_v44 = vmul.f32 0.2, %v639_v40  ;;  %v631_v45 = vadd.f32 %v630_v42, %v533_v29  ;;  %v662_v61 = vsel %vm646_vm11, %v628_v39, %v654_v48  ;;  %v3738_v29 = vld [vmem:[%s4542_s4 + $0x20] sm:$0xff]   ;;  %v901_v37 = vpop.permute.xlu1 %900 }
 0x2a2   :  { %v665_v49 = vsel %vm649_vm9, %v639_v40, %v657_v44  ;;  %vm647_vm10 = vcmp.gt.f32.partialorder %v631_v45, 0.0  ;;  %v655_v50 = vmul.f32 0.2, %v631_v45  ;;  %v896_v39 = vpop.permute.xlu0 %895 }
 0x2a3   :  { %v669_v52 = vpack.c.bf16 %v665_v49, %v664_v47 }
 0x2a4   :  { %v663_v57 = vsel %vm647_vm10, %v631_v45, %v655_v50  ;;  %v891_v42 = vpop.permute.xlu1 %890 }
 0x2a5   :  { %3477 = vmatpush3.bf16.msra.mxu0 %v669_v52  ;;  %3489 = vmatpush3.bf16.msra.mxu1 %v669_v52  ;;  %v668_v62 = vpack.c.bf16 %v663_v57, %v662_v61 }
 0x2a6   :  { %3478 = vmatprep.subr.bf16.mxu0 %v3780_v54  ;;  %3490 = vmatprep.subr.bf16.mxu1 %v3780_v54  ;;  %v886_v46 = vpop.permute.xlu0 %885 }
 0x2a8   :  { %v881_v53 = vpop.permute.xlu1 %880 }
 0x2a9   :  { %3479 = vmatpush3.bf16.msra.mxu0 %v668_v62  ;;  %3491 = vmatpush3.bf16.msra.mxu1 %v668_v62 }
 0x2aa   :  { %3480 = vmatprep.subr.bf16.mxu0 %v3780_v54  ;;  %3492 = vmatprep.subr.bf16.mxu1 %v3780_v54  ;;  %v876_v0 = vpop.permute.xlu0 %875 }
 0x2ad   :  { %3481 = vmatpush3.bf16.msra.mxu0 %v667_v3  ;;  %3493 = vmatpush3.bf16.msra.mxu1 %v667_v3 }
 0x2ae   :  { %3482 = vmatprep.subr.bf16.mxu0 %v3780_v54  ;;  %3494 = vmatprep.subr.bf16.mxu1 %v3780_v54 }
 0x2b1   :  { %3483 = vmatpush3.bf16.msra.mxu0 %v666_v6  ;;  %3495 = vmatpush3.bf16.msra.mxu1 %v666_v6 }
 0x2b2   :  { %3500 = vmatprep.subr.mxu0 %v3780_v54 }
 0x2b4   :  { %3485 = vmatmul.mubr.msk.bf16.vlgmr.msra.gmra.mxu0 %vm383_vm3, %v670_v7  ;;  %3497 = vmatmul.mubr.msk.bf16.vlgmr.msra.gmra.mxu1 %vm383_vm3, %v720_v8 }
 0x2b5   :  { %3502 = vmatprep.mubr.msk.f32.mxu0 %vm3781_vm2, %v3780_v54  ;;  %3507 = vmatprep.mubr.msk.bf16.mxu1 %vm46_vm0, %v3734_v9 }
 0x374   :  { %v714_v11 = vpop.f32.mrf.mxu0  ;;  %v764_v12 = vpop.f32.mrf.mxu1 }
 0x375   :  { %v4266_v13 = vadd.f32 %v714_v11, %v675_v10  ;;  %v765_v23 = vadd.f32 %v764_v12, %v725_v22 }
 0x376   :  { %v3486_v14 = vpop.f32.mrf.mxu0  ;;  %v3498_v15 = vpop.f32.mrf.mxu1 }
 0x377   :  { %v770_v16 = vmul.f32 1.442695, %v4266_v13 }
 0x378   :  { %v717_v17 = vpop.f32.mrf.mxu0  ;;  %v767_v18 = vpop.f32.mrf.mxu1 }
 0x379   :  { %3770 = vpow2.f32 %v770_v16  ;;  %v3739_v16 = vld [vmem:[%s4542_s4 + $0x28] sm:$0xff]   ;;  %v3740_v17 = vld [vmem:[%s4542_s4 + $0x30] sm:$0xff]   ;;  %v3741_v18 = vld [vmem:[%s4542_s4 + $0x38] sm:$0xff]  }
 0x37a   :  { %v3487_v19 = vpop.f32.mrf.mxu0  ;;  %v3499_v20 = vpop.f32.mrf.mxu1 }
 0x37b   :  { %v3742_v19 = vld [vmem:[%s4543_s6 + $0x20] sm:$0xff]   ;;  %v1097_v20 = vpop.permute.xlu1 %1096 }
 0x386   :  { %v3771_v21 = vpop.eup %3770 }
 0x387   :  { %v772_v24 = vmul.f32 %v3771_v21, %v4224_v36  ;;  %v3736_v36 = vld [vmem:[%s4535_s2 + $0x30] sm:$0xff]   ;;  %v1092_v21 = vpop.permute.xlu0 %1091 }
 0x389   :  { %v773_v25 = vadd.f32 %v772_v24, %v765_v23  ;;  %v1087_v24 = vpop.permute.xlu1 %1086 }
 0x38b   :  { %3056 = vst.msk [vmem:[%s4536_s12 + $0x8] sm:$0xff] %vm46_vm0, %v773_v25  ;;  %v863_v26 = vpack.c.bf16 %v773_v25, %v773_v25  ;;  %3501 = vmatpush3.msra.mxu0 %v773_v25 }
 0x38c   :  { %3503 = vmatmul.mubr.msk.f32.vlgmr.msra.gmra.mxu0 %vm46_vm0, %v4024_v55  ;;  %v3737_v55 = vld [vmem:[%s4535_s2 + $0x38] sm:$0xff]  }
 0x38d   :  { %3714 = vmatprep.subr.msk.bf16.mxu1 %vm210_vm1, %v863_v26  ;;  %v946_v27 = vsel %vm210_vm1, %v863_v26, 0  ;;  %3523 = vmatprep.mubr.msk.bf16.mxu0 %vm383_vm3, %v3738_v29  ;;  %v1082_v26 = vpop.permute.xlu0 %1081 }
 0x38e   :  { %3506 = vmatpush3.bf16.msra.mxu1 %v946_v27 }
 0x391   :  { %3508 = vmatmul.mubr.msk.bf16.vlgmr.msra.gmra.mxu1 %vm46_vm0, %v3735_v28 }
 0x392   :  { %3511 = vmatprep.mubr.msk.bf16.mxu1 %vm46_vm0, %v3736_v36  ;;  %v1077_v36 = vpop.permute.xlu1 %1076 }
 0x399   :  { %3512 = vmatmul.mubr.msk.bf16.gmra.mxu1 %vm46_vm0, %v3737_v55 }
 0x39a   :  { %3539 = vmatprep.mubr.msk.bf16.mxu1 %vm383_vm3, %v3742_v19 }
 0x44c   :  { %v4294_v30 = vpop.f32.mrf.mxu0 }
 0x44e   :  { %v3504_v32 = vpop.f32.mrf.mxu0 }
 0x44f   :  { %v1072_v32 = vpop.permute.xlu0 %1071 }
 0x451   :  { %v3509_v34 = vpop.f32.mrf.mxu1 }
 0x452   :  { %v991_v51 = vadd.f32 %v3509_v34, %v886_v46 }
 0x453   :  { %v982_v35 = vpop.f32.mrf.mxu1 }
 0x454   :  { %v1023_v2 = vmul.f32 0.2, %v991_v51  ;;  %v983_v3 = vadd.f32 %v982_v35, %v876_v0  ;;  %vm1015_vm9 = vcmp.gt.f32.partialorder %v991_v51, 0.0 }
 0x455   :  { %v3510_v38 = vpop.f32.mrf.mxu1 }
 0x456   :  { %v994_v47 = vadd.f32 %v3510_v38, %v891_v42  ;;  %v1021_v9 = vmul.f32 0.2, %v983_v3  ;;  %v1031_v10 = vsel %vm1015_vm9, %v991_v51, %v1023_v2  ;;  %vm1013_vm11 = vcmp.gt.f32.partialorder %v983_v3, 0.0  ;;  %v3743_v2 = vld [vmem:[%s4543_s6 + $0x28] sm:$0xff]  }
 0x457   :  { %v985_v40 = vpop.f32.mrf.mxu1 }
 0x458   :  { %v1024_v59 = vmul.f32 0.2, %v994_v47  ;;  %v986_v60 = vadd.f32 %v985_v40, %v881_v53  ;;  %vm1016_vm8 = vcmp.gt.f32.partialorder %v994_v47, 0.0  ;;  %v1029_v14 = vsel %vm1013_vm11, %v983_v3, %v1021_v9  ;;  %v1067_v40 = vpop.permute.xlu1 %1066  ;;  %v3744_v3 = vld [vmem:[%s4543_s6 + $0x30] sm:$0xff]  }
 0x459   :  { %v3513_v41 = vpop.f32.mrf.mxu1 }
 0x45a   :  { %v1007_v43 = vadd.f32 %v3513_v41, %v906_v33  ;;  %v1022_v7 = vmul.f32 0.2, %v986_v60  ;;  %v1032_v8 = vsel %vm1016_vm8, %v994_v47, %v1024_v59  ;;  %vm1014_vm10 = vcmp.gt.f32.partialorder %v986_v60, 0.0 }
 0x45b   :  { %v998_v44 = vpop.f32.mrf.mxu1  ;;  %v1047_v11 = vpack.c.bf16 %v1032_v8, %v1031_v10 }
 0x45c   :  { %v999_v45 = vadd.f32 %v998_v44, %v896_v39  ;;  %v1027_v49 = vmul.f32 0.2, %v1007_v43  ;;  %vm1019_vm4 = vcmp.gt.f32.partialorder %v1007_v43, 0.0  ;;  %v1030_v12 = vsel %vm1014_vm10, %v986_v60, %v1022_v7 }
 0x45d   :  { %v3514_v48 = vpop.f32.mrf.mxu1  ;;  %v1046_v15 = vpack.c.bf16 %v1030_v12, %v1029_v14 }
 0x45e   :  { %v1010_v50 = vadd.f32 %v3514_v48, %v911_v31  ;;  %v1025_v56 = vmul.f32 0.2, %v999_v45  ;;  %vm1017_vm6 = vcmp.gt.f32.partialorder %v999_v45, 0.0  ;;  %v1035_v62 = vsel %vm1019_vm4, %v1007_v43, %v1027_v49  ;;  %v1062_v49 = vpop.permute.xlu0 %1061 }
 0x45f   :  { %v1001_v52 = vpop.f32.mrf.mxu1 }
 0x460   :  { %vm1020_vm5 = vcmp.gt.f32.partialorder %v1010_v50, 0.0  ;;  %v1028_v57 = vmul.f32 0.2, %v1010_v50  ;;  %v1002_v58 = vadd.f32 %v1001_v52, %v901_v37  ;;  %v1033_v4 = vsel %vm1017_vm6, %v999_v45, %v1025_v56 }
 0x462   :  { %vm1018_vm7 = vcmp.gt.f32.partialorder %v1002_v58, 0.0  ;;  %v1026_v61 = vmul.f32 0.2, %v1002_v58  ;;  %v1036_v63 = vsel %vm1020_vm5, %v1010_v50, %v1028_v57  ;;  %v1275_v7 = vpop.permute.xlu0 %1274 }
 0x463   :  { %v1049_v1 = vpack.c.bf16 %v1036_v63, %v1035_v62 }
 0x464   :  { %v1034_v5 = vsel %vm1018_vm7, %v1002_v58, %v1026_v61 }
 0x465   :  { %3515 = vmatprep.subr.bf16.mxu0 %v1049_v1  ;;  %v1048_v6 = vpack.c.bf16 %v1034_v5, %v1033_v4  ;;  %v3745_v4 = vld [vmem:[%s4543_s6 + $0x38] sm:$0xff]   ;;  %v1280_v5 = vpop.permute.xlu1 %1279 }
 0x466   :  { %3516 = vmatpush3.bf16.msra.mxu0 %v1049_v1  ;;  %v1265_v12 = vpop.permute.xlu0 %1264 }
 0x467   :  { %3517 = vmatprep.subr.bf16.mxu0 %v1048_v6 }
 0x469   :  { %v1270_v10 = vpop.permute.xlu1 %1269 }
 0x46a   :  { %3518 = vmatpush3.bf16.msra.mxu0 %v1048_v6 }
 0x46b   :  { %3519 = vmatprep.subr.bf16.mxu0 %v1047_v11 }
 0x46e   :  { %3520 = vmatpush3.bf16.msra.mxu0 %v1047_v11 }
 0x46f   :  { %3521 = vmatprep.subr.bf16.mxu0 %v1046_v15 }
 0x472   :  { %3522 = vmatpush3.bf16.msra.mxu0 %v1046_v15 }
 0x473   :  { %3547 = vmatprep.subr.bf16.mxu0 %v3780_v54 }
 0x475   :  { %3524 = vmatmul.mubr.msk.bf16.vlgmr.msra.gmra.mxu0 %vm383_vm3, %v3739_v16 }
 0x476   :  { %3527 = vmatprep.mubr.msk.bf16.mxu0 %vm383_vm3, %v3740_v17  ;;  %v1260_v17 = vpop.permute.xlu1 %1259 }
 0x47d   :  { %3528 = vmatmul.mubr.msk.bf16.gmra.mxu0 %vm383_vm3, %v3741_v18 }
 0x47e   :  { %3555 = vmatprep.mubr.msk.bf16.mxu0 %vm3781_vm2, %v3780_v54 }
 0x535   :  { %v3525_v22 = vpop.f32.mrf.mxu0 }
 0x536   :  { %v1174_v38 = vadd.f32 %v3525_v22, %v1072_v32  ;;  %v1255_v22 = vpop.permute.xlu0 %1254 }
 0x537   :  { %v1165_v23 = vpop.f32.mrf.mxu0 }
 0x538   :  { %v1206_v51 = vmul.f32 0.2, %v1174_v38  ;;  %v1166_v52 = vadd.f32 %v1165_v23, %v1062_v49  ;;  %vm1198_vm5 = vcmp.gt.f32.partialorder %v1174_v38, 0.0 }
 0x539   :  { %v3526_v25 = vpop.f32.mrf.mxu0 }
 0x53a   :  { %v1177_v33 = vadd.f32 %v3526_v25, %v1077_v36  ;;  %v1204_v60 = vmul.f32 0.2, %v1166_v52  ;;  %v1214_v61 = vsel %vm1198_vm5, %v1174_v38, %v1206_v51  ;;  %vm1196_vm7 = vcmp.gt.f32.partialorder %v1166_v52, 0.0  ;;  %v3133_v51 = vld [vmem:[%s4545_s10 + $0x4] sm:$0xf] }
 0x53b   :  { %v1168_v27 = vpop.f32.mrf.mxu0 }
 0x53c   :  { %v1207_v44 = vmul.f32 0.2, %v1177_v33  ;;  %v1169_v45 = vadd.f32 %v1168_v27, %v1067_v40  ;;  %vm1199_vm4 = vcmp.gt.f32.partialorder %v1177_v33, 0.0  ;;  %v1212_v0 = vsel %vm1196_vm7, %v1166_v52, %v1204_v60  ;;  %v3746_v52 = vld [vmem:[%s4535_s2 + $0x40] sm:$0xff]  }
 0x53d   :  { %v3529_v28 = vpop.f32.mrf.mxu0 }
 0x53e   :  { %v1190_v55 = vadd.f32 %v3529_v28, %v1092_v21  ;;  %v1205_v58 = vmul.f32 0.2, %v1169_v45  ;;  %v1215_v59 = vsel %vm1199_vm4, %v1177_v33, %v1207_v44  ;;  %vm1197_vm6 = vcmp.gt.f32.partialorder %v1169_v45, 0.0 }
 0x53f   :  { %v1181_v29 = vpop.f32.mrf.mxu0  ;;  %v1230_v62 = vpack.c.bf16 %v1215_v59, %v1214_v61 }
 0x540   :  { %v1182_v31 = vadd.f32 %v1181_v29, %v1082_v26  ;;  %v1210_v35 = vmul.f32 0.2, %v1190_v55  ;;  %vm1202_vm12 = vcmp.gt.f32.partialorder %v1190_v55, 0.0  ;;  %v1213_v63 = vsel %vm1197_vm6, %v1169_v45, %v1205_v58 }
 0x541   :  { %v3530_v34 = vpop.f32.mrf.mxu0  ;;  %v1229_v1 = vpack.c.bf16 %v1213_v63, %v1212_v0 }
 0x542   :  { %v1193_v37 = vadd.f32 %v3530_v34, %v1097_v20  ;;  %v1208_v41 = vmul.f32 0.2, %v1182_v31  ;;  %vm1200_vm14 = vcmp.gt.f32.partialorder %v1182_v31, 0.0  ;;  %v1218_v47 = vsel %vm1202_vm12, %v1190_v55, %v1210_v35 }
 0x543   :  { %v1184_v39 = vpop.f32.mrf.mxu0 }
 0x544   :  { %vm1203_vm13 = vcmp.gt.f32.partialorder %v1193_v37, 0.0  ;;  %v1211_v42 = vmul.f32 0.2, %v1193_v37  ;;  %v1185_v43 = vadd.f32 %v1184_v39, %v1087_v24  ;;  %v1216_v53 = vsel %vm1200_vm14, %v1182_v31, %v1208_v41  ;;  %v1250_v31 = vpop.permute.xlu1 %1249 }
 0x546   :  { %vm1201_vm15 = vcmp.gt.f32.partialorder %v1185_v43, 0.0  ;;  %v1209_v46 = vmul.f32 0.2, %v1185_v43  ;;  %v1219_v48 = vsel %vm1203_vm13, %v1193_v37, %v1211_v42  ;;  %v1245_v37 = vpop.permute.xlu0 %1244 }
 0x547   :  { %v1232_v50 = vpack.c.bf16 %v1219_v48, %v1218_v47 }
 0x548   :  { %v1217_v56 = vsel %vm1201_vm15, %v1185_v43, %v1209_v46 }
 0x549   :  { %3531 = vmatprep.subr.bf16.mxu1 %v1232_v50  ;;  %v1231_v57 = vpack.c.bf16 %v1217_v56, %v1216_v53  ;;  %v774_v53 = vsel %vm46_vm0, %v4266_v13, 0.0 }
 0x54a   :  { %3532 = vmatpush3.bf16.msra.mxu1 %v1232_v50  ;;  %v3130_v50 = vld [vmem:[%s4544_s8 + $0x4] sm:$0xf]  ;;  %v775_v56 = vrot.slane %v774_v53, 4  ;;  %v1414_v58 = vpop.permute.xlu0 %1413 }
 0x54b   :  { %3533 = vmatprep.subr.bf16.mxu1 %v1231_v57 }
 0x54e   :  { %3534 = vmatpush3.bf16.msra.mxu1 %v1231_v57  ;;  %v776_v57 = vadd.f32 %v775_v56, %v774_v53 }
 0x54f   :  { %3535 = vmatprep.subr.bf16.mxu1 %v1230_v62 }
 0x552   :  { %3536 = vmatpush3.bf16.msra.mxu1 %v1230_v62  ;;  %v777_v62 = vrot.slane %v776_v57, 2 }
 0x553   :  { %3537 = vmatprep.subr.bf16.mxu1 %v1229_v1 }
 0x556   :  { %3538 = vmatpush3.bf16.msra.mxu1 %v1229_v1 }
 0x557   :  { %3559 = vmatprep.subr.bf16.mxu1 %v3780_v54 }
 0x559   :  { %3540 = vmatmul.mubr.msk.bf16.vlgmr.msra.gmra.mxu1 %vm383_vm3, %v3743_v2 }
 0x55a   :  { %3543 = vmatprep.mubr.msk.bf16.mxu1 %vm383_vm3, %v3744_v3 }
 0x561   :  { %3544 = vmatmul.mubr.msk.bf16.gmra.mxu1 %vm383_vm3, %v3745_v4 }
 0x562   :  { %3567 = vmatprep.mubr.msk.bf16.mxu1 %vm3781_vm2, %v3780_v54 }
 0x619   :  { %v3541_v6 = vpop.f32.mrf.mxu1 }
 0x61a   :  { %v1357_v27 = vadd.f32 %v3541_v6, %v1255_v22  ;;  %v778_v6 = vadd.f32 %v777_v62, %v776_v57 }
 0x61b   :  { %v1348_v8 = vpop.f32.mrf.mxu1 }
 0x61c   :  { %v1389_v38 = vmul.f32 0.2, %v1357_v27  ;;  %v1349_v39 = vadd.f32 %v1348_v8, %v1245_v37  ;;  %vm1381_vm13 = vcmp.gt.f32.partialorder %v1357_v27, 0.0 }
 0x61d   :  { %v3542_v9 = vpop.f32.mrf.mxu1 }
 0x61e   :  { %v1360_v24 = vadd.f32 %v3542_v9, %v1260_v17  ;;  %v1397_v44 = vsel %vm1381_vm13, %v1357_v27, %v1389_v38  ;;  %v1387_v45 = vmul.f32 0.2, %v1349_v39  ;;  %vm1379_vm15 = vcmp.gt.f32.partialorder %v1349_v39, 0.0  ;;  %v3750_v27 = vld [vmem:[%s4542_s4 + $0x40] sm:$0xff]  }
 0x61f   :  { %v1351_v11 = vpop.f32.mrf.mxu1 }
 0x620   :  { %v1390_v33 = vmul.f32 0.2, %v1360_v24  ;;  %v1352_v34 = vadd.f32 %v1351_v11, %v1250_v31  ;;  %vm1382_vm12 = vcmp.gt.f32.partialorder %v1360_v24, 0.0  ;;  %v1395_v48 = vsel %vm1379_vm15, %v1349_v39, %v1387_v45 }
 0x621   :  { %v3545_v14 = vpop.f32.mrf.mxu1 }
 0x622   :  { %v1373_v15 = vadd.f32 %v3545_v14, %v1275_v7  ;;  %v1398_v42 = vsel %vm1382_vm12, %v1360_v24, %v1390_v33  ;;  %v1388_v43 = vmul.f32 0.2, %v1352_v34  ;;  %vm1380_vm14 = vcmp.gt.f32.partialorder %v1352_v34, 0.0  ;;  %v3747_v24 = vld [vmem:[%s4535_s2 + $0x48] sm:$0xff]  }
 0x623   :  { %v1364_v16 = vpop.f32.mrf.mxu1  ;;  %v1404_v46 = vpack.c.bf16 %v1398_v42, %v1397_v44 }
 0x624   :  { %v1393_v18 = vmul.f32 0.2, %v1373_v15  ;;  %vm1385_vm8 = vcmp.gt.f32.partialorder %v1373_v15, 0.0  ;;  %v1365_v20 = vadd.f32 %v1364_v16, %v1265_v12  ;;  %v1396_v47 = vsel %vm1380_vm14, %v1352_v34, %v1388_v43 }
 0x625   :  { %v3546_v19 = vpop.f32.mrf.mxu1  ;;  %v1403_v49 = vpack.c.bf16 %v1396_v47, %v1395_v48 }
 0x626   :  { %v1376_v21 = vadd.f32 %v3546_v19, %v1280_v5  ;;  %v1401_v28 = vsel %vm1385_vm8, %v1373_v15, %v1393_v18  ;;  %v1391_v36 = vmul.f32 0.2, %v1365_v20  ;;  %vm1383_vm11 = vcmp.gt.f32.partialorder %v1365_v20, 0.0  ;;  %v1466_v18 = vpop.permute.xlu1 %1465 }
 0x627   :  { %v1367_v23 = vpop.f32.mrf.mxu1 }
 0x628   :  { %vm1386_vm9 = vcmp.gt.f32.partialorder %v1376_v21, 0.0  ;;  %v1394_v25 = vmul.f32 0.2, %v1376_v21  ;;  %v1368_v26 = vadd.f32 %v1367_v23, %v1270_v10  ;;  %v1399_v40 = vsel %vm1383_vm11, %v1365_v20, %v1391_v36  ;;  %v4364_v23 = vld [vmem:[%s4541_s1] sm:$0xff] }
 0x629   :  { %v779_v10 = vrot.slane %v778_v6, 1 }
 0x62a   :  { %v1402_v55 = vsel %vm1386_vm9, %v1376_v21, %v1394_v25  ;;  %vm1384_vm10 = vcmp.gt.f32.partialorder %v1368_v26, 0.0  ;;  %v1392_v29 = vmul.f32 0.2, %v1368_v26  ;;  %v3748_v25 = vld [vmem:[%s4535_s2 + $0x50] sm:$0xff]   ;;  %v1652_v36 = vpop.permute.xlu1 %1651 }
 0x62b   :  { %v1406_v32 = vpack.c.bf16 %v1402_v55, %v1401_v28  ;;  %v780_v14 = vadd.f32 %v779_v10, %v778_v6 }
 0x62c   :  { %v1400_v35 = vsel %vm1384_vm10, %v1368_v26, %v1392_v29  ;;  %v3749_v26 = vld [vmem:[%s4535_s2 + $0x58] sm:$0xff]   ;;  %v1647_v29 = vpop.permute.xlu0 %1646 }
 0x62d   :  { %3548 = vmatpush3.bf16.msra.mxu0 %v1406_v32  ;;  %3560 = vmatpush3.bf16.msra.mxu1 %v1406_v32  ;;  %v1405_v41 = vpack.c.bf16 %v1400_v35, %v1399_v40 }
 0x62e   :  { %3549 = vmatprep.subr.bf16.mxu0 %v3780_v54  ;;  %3561 = vmatprep.subr.bf16.mxu1 %v3780_v54  ;;  %v1642_v33 = vpop.permute.xlu1 %1641 }
 0x630   :  { %v1637_v35 = vpop.permute.xlu0 %1636 }
 0x631   :  { %3550 = vmatpush3.bf16.msra.mxu0 %v1405_v41  ;;  %3562 = vmatpush3.bf16.msra.mxu1 %v1405_v41 }
 0x632   :  { %3551 = vmatprep.subr.bf16.mxu0 %v3780_v54  ;;  %3563 = vmatprep.subr.bf16.mxu1 %v3780_v54  ;;  %v1632_v39 = vpop.permute.xlu1 %1631 }
 0x634   :  { %v1627_v43 = vpop.permute.xlu0 %1626 }
 0x635   :  { %3552 = vmatpush3.bf16.msra.mxu0 %v1404_v46  ;;  %3564 = vmatpush3.bf16.msra.mxu1 %v1404_v46 }
 0x636   :  { %3553 = vmatprep.subr.bf16.mxu0 %v3780_v54  ;;  %3565 = vmatprep.subr.bf16.mxu1 %v3780_v54 }
 0x639   :  { %3554 = vmatpush3.bf16.msra.mxu0 %v1403_v49  ;;  %3566 = vmatpush3.bf16.msra.mxu1 %v1403_v49 }
 0x63a   :  { %3571 = vmatprep.subr.mxu0 %v3780_v54 }
 0x63c   :  { %3556 = vmatmul.mubr.msk.bf16.vlgmr.msra.gmra.mxu0 %vm383_vm3, %v3130_v50  ;;  %3568 = vmatmul.mubr.msk.bf16.vlgmr.msra.gmra.mxu1 %vm383_vm3, %v3133_v51  ;;  %v1622_v50 = vpop.permute.xlu1 %1621 }
 0x63d   :  { %3573 = vmatprep.mubr.msk.f32.mxu0 %vm3781_vm2, %v3780_v54  ;;  %3578 = vmatprep.mubr.msk.bf16.mxu1 %vm46_vm0, %v3746_v52 }
 0x6fc   :  { %v1453_v59 = vpop.f32.mrf.mxu0  ;;  %v1505_v60 = vpop.f32.mrf.mxu1 }
 0x6fd   :  { %v1454_v61 = vadd.f32 %v1453_v59, %v1414_v58  ;;  %v1506_v19 = vadd.f32 %v1505_v60, %v1466_v18 }
 0x6fe   :  { %v3557_v63 = vpop.f32.mrf.mxu0  ;;  %v3569_v0 = vpop.f32.mrf.mxu1 }
 0x6ff   :  { %v1511_v1 = vmul.f32 1.442695, %v1454_v61  ;;  %v1515_v2 = vsel %vm46_vm0, %v1454_v61, 0.0  ;;  %v1617_v61 = vpop.permute.xlu0 %1616 }
 0x700   :  { %v1516_v3 = vrot.slane %v1515_v2, 4  ;;  %v1456_v4 = vpop.f32.mrf.mxu0  ;;  %v1508_v5 = vpop.f32.mrf.mxu1 }
 0x701   :  { %3772 = vpow2.f32 %v1511_v1 }
 0x702   :  { %v1517_v7 = vadd.f32 %v1516_v3, %v1515_v2  ;;  %v3558_v8 = vpop.f32.mrf.mxu0  ;;  %v3570_v13 = vpop.f32.mrf.mxu1 }
 0x703   :  { %v1833_v18 = vpop.permute.xlu0 %1832 }
 0x704   :  { %v1518_v9 = vrot.slane %v1517_v7, 2 }
 0x706   :  { %v1519_v11 = vadd.f32 %v1518_v9, %v1517_v7 }
 0x708   :  { %v1520_v12 = vrot.slane %v1519_v11, 1 }
 0x70a   :  { %v1521_v15 = vadd.f32 %v1520_v12, %v1519_v11  ;;  %v3751_v11 = vld [vmem:[%s4542_s4 + $0x48] sm:$0xff]   ;;  %v3752_v12 = vld [vmem:[%s4542_s4 + $0x50] sm:$0xff]  }
 0x70c   :  { %v4354_v16 = vadd.f32 %v1521_v15, %v780_v14  ;;  %v3753_v14 = vld [vmem:[%s4542_s4 + $0x58] sm:$0xff]   ;;  %v3754_v15 = vld [vmem:[%s4543_s6 + $0x40] sm:$0xff]  }
 0x70e   :  { %v3773_v17 = vpop.eup %3772 }
 0x70f   :  { %v1513_v20 = vmul.f32 %v3773_v17, %v4294_v30  ;;  %v1838_v17 = vpop.permute.xlu1 %1837 }
 0x711   :  { %v1514_v21 = vadd.f32 %v1513_v20, %v1506_v19 }
 0x713   :  { %3136 = vst.msk [vmem:[%s4536_s12 + $0x10] sm:$0xff] %vm46_vm0, %v1514_v21  ;;  %v1604_v22 = vpack.c.bf16 %v1514_v21, %v1514_v21  ;;  %3572 = vmatpush3.msra.mxu0 %v1514_v21  ;;  %v1828_v21 = vpop.permute.xlu1 %1827 }
 0x714   :  { %3574 = vmatmul.mubr.msk.f32.vlgmr.msra.gmra.mxu0 %vm46_vm0, %v4364_v23 }
 0x715   :  { %3715 = vmatprep.subr.msk.bf16.mxu1 %vm210_vm1, %v1604_v22  ;;  %v1687_v30 = vsel %vm210_vm1, %v1604_v22, 0  ;;  %3594 = vmatprep.mubr.msk.bf16.mxu0 %vm383_vm3, %v3750_v27 }
 0x716   :  { %3577 = vmatpush3.bf16.msra.mxu1 %v1687_v30  ;;  %v1823_v30 = vpop.permute.xlu0 %1822 }
 0x719   :  { %3579 = vmatmul.mubr.msk.bf16.vlgmr.msra.gmra.mxu1 %vm46_vm0, %v3747_v24 }
 0x71a   :  { %3582 = vmatprep.mubr.msk.bf16.mxu1 %vm46_vm0, %v3748_v25 }
 0x721   :  { %3583 = vmatmul.mubr.msk.bf16.gmra.mxu1 %vm46_vm0, %v3749_v26  ;;  %v1818_v26 = vpop.permute.xlu1 %1817 }
 0x722   :  { %3610 = vmatprep.mubr.msk.bf16.mxu1 %vm383_vm3, %v3754_v15 }
 0x7d4   :  { %v4386_v28 = vpop.f32.mrf.mxu0 }
 0x7d6   :  { %v3575_v55 = vpop.f32.mrf.mxu0 }
 0x7d9   :  { %v3580_v31 = vpop.f32.mrf.mxu1 }
 0x7da   :  { %v1732_v48 = vadd.f32 %v3580_v31, %v1627_v43 }
 0x7db   :  { %v1723_v32 = vpop.f32.mrf.mxu1 }
 0x7dc   :  { %v1764_v63 = vmul.f32 0.2, %v1732_v48  ;;  %v1724_v0 = vadd.f32 %v1723_v32, %v1617_v61  ;;  %vm1756_vm9 = vcmp.gt.f32.partialorder %v1732_v48, 0.0 }
 0x7dd   :  { %v3581_v34 = vpop.f32.mrf.mxu1 }
 0x7de   :  { %v1735_v44 = vadd.f32 %v3581_v34, %v1632_v39  ;;  %v1762_v6 = vmul.f32 0.2, %v1724_v0  ;;  %v1772_v7 = vsel %vm1756_vm9, %v1732_v48, %v1764_v63  ;;  %vm1754_vm11 = vcmp.gt.f32.partialorder %v1724_v0, 0.0 }
 0x7df   :  { %v1726_v37 = vpop.f32.mrf.mxu1 }
 0x7e0   :  { %v1765_v56 = vmul.f32 0.2, %v1735_v44  ;;  %v1727_v57 = vadd.f32 %v1726_v37, %v1622_v50  ;;  %vm1757_vm8 = vcmp.gt.f32.partialorder %v1735_v44, 0.0  ;;  %v1770_v9 = vsel %vm1754_vm11, %v1724_v0, %v1762_v6  ;;  %v3755_v0 = vld [vmem:[%s4543_s6 + $0x48] sm:$0xff]  }
 0x7e1   :  { %v3584_v38 = vpop.f32.mrf.mxu1 }
 0x7e2   :  { %v1748_v40 = vadd.f32 %v3584_v38, %v1647_v29  ;;  %v1763_v4 = vmul.f32 0.2, %v1727_v57  ;;  %v1773_v5 = vsel %vm1757_vm8, %v1735_v44, %v1765_v56  ;;  %vm1755_vm10 = vcmp.gt.f32.partialorder %v1727_v57, 0.0  ;;  %v1813_v29 = vpop.permute.xlu0 %1812  ;;  %v1808_v38 = vpop.permute.xlu1 %1807 }
 0x7e3   :  { %v1739_v41 = vpop.f32.mrf.mxu1  ;;  %v1788_v8 = vpack.c.bf16 %v1773_v5, %v1772_v7 }
 0x7e4   :  { %v1740_v42 = vadd.f32 %v1739_v41, %v1637_v35  ;;  %v1768_v46 = vmul.f32 0.2, %v1748_v40  ;;  %vm1760_vm4 = vcmp.gt.f32.partialorder %v1748_v40, 0.0  ;;  %v1771_v13 = vsel %vm1755_vm10, %v1727_v57, %v1763_v4 }
 0x7e5   :  { %v3585_v45 = vpop.f32.mrf.mxu1  ;;  %v1787_v10 = vpack.c.bf16 %v1771_v13, %v1770_v9 }
 0x7e6   :  { %v1751_v47 = vadd.f32 %v3585_v45, %v1652_v36  ;;  %v1766_v51 = vmul.f32 0.2, %v1740_v42  ;;  %vm1758_vm6 = vcmp.gt.f32.partialorder %v1740_v42, 0.0  ;;  %v1776_v59 = vsel %vm1760_vm4, %v1748_v40, %v1768_v46 }
 0x7e7   :  { %v1742_v49 = vpop.f32.mrf.mxu1 }
 0x7e8   :  { %vm1761_vm5 = vcmp.gt.f32.partialorder %v1751_v47, 0.0  ;;  %v1769_v52 = vmul.f32 0.2, %v1751_v47  ;;  %v1743_v53 = vadd.f32 %v1742_v49, %v1642_v33  ;;  %v1774_v1 = vsel %vm1758_vm6, %v1740_v42, %v1766_v51 }
 0x7ea   :  { %vm1759_vm7 = vcmp.gt.f32.partialorder %v1743_v53, 0.0  ;;  %v1767_v58 = vmul.f32 0.2, %v1743_v53  ;;  %v1777_v60 = vsel %vm1761_vm5, %v1751_v47, %v1769_v52  ;;  %v1803_v47 = vpop.permute.xlu0 %1802 }
 0x7eb   :  { %v1790_v62 = vpack.c.bf16 %v1777_v60, %v1776_v59 }
 0x7ec   :  { %v1775_v2 = vsel %vm1759_vm7, %v1743_v53, %v1767_v58 }
 0x7ed   :  { %3586 = vmatprep.subr.bf16.mxu0 %v1790_v62  ;;  %v1789_v3 = vpack.c.bf16 %v1775_v2, %v1774_v1  ;;  %v3756_v1 = vld [vmem:[%s4543_s6 + $0x50] sm:$0xff]   ;;  %v3757_v2 = vld [vmem:[%s4543_s6 + $0x58] sm:$0xff]  }
 0x7ee   :  { %3587 = vmatpush3.bf16.msra.mxu0 %v1790_v62  ;;  %v2016_v5 = vpop.permute.xlu0 %2015 }
 0x7ef   :  { %3588 = vmatprep.subr.bf16.mxu0 %v1789_v3 }
 0x7f2   :  { %3589 = vmatpush3.bf16.msra.mxu0 %v1789_v3  ;;  %v2021_v3 = vpop.permute.xlu1 %2020  ;;  %v2006_v9 = vpop.permute.xlu0 %2005 }
 0x7f3   :  { %3590 = vmatprep.subr.bf16.mxu0 %v1788_v8 }
 0x7f6   :  { %3591 = vmatpush3.bf16.msra.mxu0 %v1788_v8  ;;  %v2011_v8 = vpop.permute.xlu1 %2010 }
 0x7f7   :  { %3592 = vmatprep.subr.bf16.mxu0 %v1787_v10 }
 0x7fa   :  { %3593 = vmatpush3.bf16.msra.mxu0 %v1787_v10 }
 0x7fb   :  { %3618 = vmatprep.subr.bf16.mxu0 %v3780_v54 }
 0x7fd   :  { %3595 = vmatmul.mubr.msk.bf16.vlgmr.msra.gmra.mxu0 %vm383_vm3, %v3751_v11 }
 0x7fe   :  { %3598 = vmatprep.mubr.msk.bf16.mxu0 %vm383_vm3, %v3752_v12 }
 0x805   :  { %3599 = vmatmul.mubr.msk.bf16.gmra.mxu0 %vm383_vm3, %v3753_v14  ;;  %v2001_v14 = vpop.permute.xlu1 %2000 }
 0x806   :  { %3626 = vmatprep.mubr.msk.bf16.mxu0 %vm3781_vm2, %v3780_v54 }
 0x8bd   :  { %v3596_v19 = vpop.f32.mrf.mxu0 }
 0x8be   :  { %v1915_v35 = vadd.f32 %v3596_v19, %v1813_v29  ;;  %v1991_v29 = vpop.permute.xlu1 %1990 }
 0x8bf   :  { %v1906_v20 = vpop.f32.mrf.mxu0 }
 0x8c0   :  { %v1947_v49 = vmul.f32 0.2, %v1915_v35  ;;  %v1907_v50 = vadd.f32 %v1906_v20, %v1803_v47  ;;  %vm1939_vm5 = vcmp.gt.f32.partialorder %v1915_v35, 0.0  ;;  %v1996_v20 = vpop.permute.xlu0 %1995 }
 0x8c1   :  { %v3597_v22 = vpop.f32.mrf.mxu0 }
 0x8c2   :  { %v1918_v31 = vadd.f32 %v3597_v22, %v1818_v26  ;;  %v1945_v58 = vmul.f32 0.2, %v1907_v50  ;;  %v1955_v59 = vsel %vm1939_vm5, %v1915_v35, %v1947_v49  ;;  %vm1937_vm7 = vcmp.gt.f32.partialorder %v1907_v50, 0.0  ;;  %v3210_v49 = vld [vmem:[%s4544_s8 + $0x8] sm:$0xf] }
 0x8c3   :  { %v1909_v24 = vpop.f32.mrf.mxu0 }
 0x8c4   :  { %v1948_v42 = vmul.f32 0.2, %v1918_v31  ;;  %v1910_v43 = vadd.f32 %v1909_v24, %v1808_v38  ;;  %vm1940_vm4 = vcmp.gt.f32.partialorder %v1918_v31, 0.0  ;;  %v1953_v62 = vsel %vm1937_vm7, %v1907_v50, %v1945_v58  ;;  %v1986_v35 = vpop.permute.xlu0 %1985  ;;  %v3213_v50 = vld [vmem:[%s4545_s10 + $0x8] sm:$0xf] }
 0x8c5   :  { %v3600_v25 = vpop.f32.mrf.mxu0 }
 0x8c6   :  { %v1931_v27 = vadd.f32 %v3600_v25, %v1833_v18  ;;  %v1946_v56 = vmul.f32 0.2, %v1910_v43  ;;  %v1956_v57 = vsel %vm1940_vm4, %v1918_v31, %v1948_v42  ;;  %vm1938_vm6 = vcmp.gt.f32.partialorder %v1910_v43, 0.0 }
 0x8c7   :  { %v1922_v36 = vpop.f32.mrf.mxu0  ;;  %v1971_v60 = vpack.c.bf16 %v1956_v57, %v1955_v59 }
 0x8c8   :  { %v1923_v55 = vadd.f32 %v1922_v36, %v1823_v30  ;;  %v1951_v33 = vmul.f32 0.2, %v1931_v27  ;;  %vm1943_vm12 = vcmp.gt.f32.partialorder %v1931_v27, 0.0  ;;  %v1954_v61 = vsel %vm1938_vm6, %v1910_v43, %v1946_v56 }
 0x8c9   :  { %v3601_v32 = vpop.f32.mrf.mxu0  ;;  %v1970_v63 = vpack.c.bf16 %v1954_v61, %v1953_v62 }
 0x8ca   :  { %v1934_v34 = vadd.f32 %v3601_v32, %v1838_v17  ;;  %v1949_v39 = vmul.f32 0.2, %v1923_v55  ;;  %vm1941_vm14 = vcmp.gt.f32.partialorder %v1923_v55, 0.0  ;;  %v1959_v45 = vsel %vm1943_vm12, %v1931_v27, %v1951_v33 }
 0x8cb   :  { %v1925_v37 = vpop.f32.mrf.mxu0 }
 0x8cc   :  { %vm1944_vm13 = vcmp.gt.f32.partialorder %v1934_v34, 0.0  ;;  %v1952_v40 = vmul.f32 0.2, %v1934_v34  ;;  %v1926_v41 = vadd.f32 %v1925_v37, %v1828_v21  ;;  %v1957_v51 = vsel %vm1941_vm14, %v1923_v55, %v1949_v39 }
 0x8ce   :  { %vm1942_vm15 = vcmp.gt.f32.partialorder %v1926_v41, 0.0  ;;  %v1950_v44 = vmul.f32 0.2, %v1926_v41  ;;  %v1960_v46 = vsel %vm1944_vm13, %v1934_v34, %v1952_v40 }
 0x8cf   :  { %v1973_v48 = vpack.c.bf16 %v1960_v46, %v1959_v45 }
 0x8d0   :  { %v1958_v52 = vsel %vm1942_vm15, %v1926_v41, %v1950_v44 }
 0x8d1   :  { %3602 = vmatprep.subr.bf16.mxu1 %v1973_v48  ;;  %v1972_v53 = vpack.c.bf16 %v1958_v52, %v1957_v51  ;;  %v3758_v51 = vld [vmem:[%s4535_s2 + $0x60] sm:$0xff]   ;;  %v2155_v52 = vpop.permute.xlu0 %2154 }
 0x8d2   :  { %3603 = vmatpush3.bf16.msra.mxu1 %v1973_v48 }
 0x8d3   :  { %3604 = vmatprep.subr.bf16.mxu1 %v1972_v53 }
 0x8d6   :  { %3605 = vmatpush3.bf16.msra.mxu1 %v1972_v53 }
 0x8d7   :  { %3606 = vmatprep.subr.bf16.mxu1 %v1971_v60 }
 0x8da   :  { %3607 = vmatpush3.bf16.msra.mxu1 %v1971_v60 }
 0x8db   :  { %3608 = vmatprep.subr.bf16.mxu1 %v1970_v63 }
 0x8de   :  { %3609 = vmatpush3.bf16.msra.mxu1 %v1970_v63 }
 0x8df   :  { %3630 = vmatprep.subr.bf16.mxu1 %v3780_v54 }
 0x8e1   :  { %3611 = vmatmul.mubr.msk.bf16.vlgmr.msra.gmra.mxu1 %vm383_vm3, %v3755_v0 }
 0x8e2   :  { %3614 = vmatprep.mubr.msk.bf16.mxu1 %vm383_vm3, %v3756_v1 }
 0x8e9   :  { %3615 = vmatmul.mubr.msk.bf16.gmra.mxu1 %vm383_vm3, %v3757_v2 }
 0x8ea   :  { %3638 = vmatprep.mubr.msk.bf16.mxu1 %vm3781_vm2, %v3780_v54 }
 0x9a1   :  { %v3612_v4 = vpop.f32.mrf.mxu1 }
 0x9a2   :  { %v2098_v25 = vadd.f32 %v3612_v4, %v1996_v20 }
 0x9a3   :  { %v2089_v6 = vpop.f32.mrf.mxu1 }
 0x9a4   :  { %v2130_v37 = vmul.f32 0.2, %v2098_v25  ;;  %v2090_v38 = vadd.f32 %v2089_v6, %v1986_v35  ;;  %vm2122_vm13 = vcmp.gt.f32.partialorder %v2098_v25, 0.0 }
 0x9a5   :  { %v3613_v7 = vpop.f32.mrf.mxu1 }
 0x9a6   :  { %v2101_v22 = vadd.f32 %v3613_v7, %v2001_v14  ;;  %v2138_v43 = vsel %vm2122_vm13, %v2098_v25, %v2130_v37  ;;  %v2128_v44 = vmul.f32 0.2, %v2090_v38  ;;  %vm2120_vm15 = vcmp.gt.f32.partialorder %v2090_v38, 0.0 }
 0x9a7   :  { %v2092_v13 = vpop.f32.mrf.mxu1 }
 0x9a8   :  { %v2131_v32 = vmul.f32 0.2, %v2101_v22  ;;  %v2093_v33 = vadd.f32 %v2092_v13, %v1991_v29  ;;  %vm2123_vm12 = vcmp.gt.f32.partialorder %v2101_v22, 0.0  ;;  %v2136_v47 = vsel %vm2120_vm15, %v2090_v38, %v2128_v44 }
 0x9a9   :  { %v3616_v10 = vpop.f32.mrf.mxu1 }
 0x9aa   :  { %v2114_v11 = vadd.f32 %v3616_v10, %v2016_v5  ;;  %v2139_v41 = vsel %vm2123_vm12, %v2101_v22, %v2131_v32  ;;  %v2129_v42 = vmul.f32 0.2, %v2093_v33  ;;  %vm2121_vm14 = vcmp.gt.f32.partialorder %v2093_v33, 0.0 }
 0x9ab   :  { %v2105_v12 = vpop.f32.mrf.mxu1  ;;  %v2145_v45 = vpack.c.bf16 %v2139_v41, %v2138_v43 }
 0x9ac   :  { %v2134_v15 = vmul.f32 0.2, %v2114_v11  ;;  %vm2126_vm8 = vcmp.gt.f32.partialorder %v2114_v11, 0.0  ;;  %v2106_v18 = vadd.f32 %v2105_v12, %v2006_v9  ;;  %v2137_v46 = vsel %vm2121_vm14, %v2093_v33, %v2129_v42  ;;  %v2207_v9 = vpop.permute.xlu1 %2206 }
 0x9ad   :  { %v3617_v17 = vpop.f32.mrf.mxu1  ;;  %v2144_v48 = vpack.c.bf16 %v2137_v46, %v2136_v47 }
 0x9ae   :  { %v2117_v19 = vadd.f32 %v3617_v17, %v2021_v3  ;;  %v2142_v26 = vsel %vm2126_vm8, %v2114_v11, %v2134_v15  ;;  %v2132_v27 = vmul.f32 0.2, %v2106_v18  ;;  %vm2124_vm11 = vcmp.gt.f32.partialorder %v2106_v18, 0.0  ;;  %v3759_v15 = vld [vmem:[%s4535_s2 + $0x68] sm:$0xff]   ;;  %v3762_v17 = vld [vmem:[%s4542_s4 + $0x60] sm:$0xff]  }
 0x9af   :  { %v2108_v21 = vpop.f32.mrf.mxu1 }
 0x9b0   :  { %vm2127_vm9 = vcmp.gt.f32.partialorder %v2117_v19, 0.0  ;;  %v2135_v30 = vmul.f32 0.2, %v2117_v19  ;;  %v2109_v24 = vadd.f32 %v2108_v21, %v2011_v8  ;;  %v2140_v39 = vsel %vm2124_vm11, %v2106_v18, %v2132_v27  ;;  %v2388_v21 = vpop.permute.xlu0 %2387 }
 0x9b2   :  { %v2143_v36 = vsel %vm2127_vm9, %v2117_v19, %v2135_v30  ;;  %vm2125_vm10 = vcmp.gt.f32.partialorder %v2109_v24, 0.0  ;;  %v2133_v55 = vmul.f32 0.2, %v2109_v24  ;;  %v2393_v19 = vpop.permute.xlu1 %2392 }
 0x9b3   :  { %v2147_v31 = vpack.c.bf16 %v2143_v36, %v2142_v26 }
 0x9b4   :  { %v2141_v34 = vsel %vm2125_vm10, %v2109_v24, %v2133_v55  ;;  %v2378_v26 = vpop.permute.xlu0 %2377 }
 0x9b5   :  { %3619 = vmatpush3.bf16.msra.mxu0 %v2147_v31  ;;  %3631 = vmatpush3.bf16.msra.mxu1 %v2147_v31  ;;  %v2146_v40 = vpack.c.bf16 %v2141_v34, %v2140_v39 }
 0x9b6   :  { %3620 = vmatprep.subr.bf16.mxu0 %v3780_v54  ;;  %3632 = vmatprep.subr.bf16.mxu1 %v3780_v54  ;;  %v2383_v24 = vpop.permute.xlu1 %2382 }
 0x9b8   :  { %v2368_v33 = vpop.permute.xlu0 %2367 }
 0x9b9   :  { %3621 = vmatpush3.bf16.msra.mxu0 %v2146_v40  ;;  %3633 = vmatpush3.bf16.msra.mxu1 %v2146_v40 }
 0x9ba   :  { %3622 = vmatprep.subr.bf16.mxu0 %v3780_v54  ;;  %3634 = vmatprep.subr.bf16.mxu1 %v3780_v54  ;;  %v2373_v55 = vpop.permute.xlu1 %2372 }
 0x9bd   :  { %3623 = vmatpush3.bf16.msra.mxu0 %v2145_v45  ;;  %3635 = vmatpush3.bf16.msra.mxu1 %v2145_v45 }
 0x9be   :  { %3624 = vmatprep.subr.bf16.mxu0 %v3780_v54  ;;  %3636 = vmatprep.subr.bf16.mxu1 %v3780_v54  ;;  %v2363_v41 = vpop.permute.xlu1 %2362 }
 0x9c1   :  { %3625 = vmatpush3.bf16.msra.mxu0 %v2144_v48  ;;  %3637 = vmatpush3.bf16.msra.mxu1 %v2144_v48 }
 0x9c2   :  { %3642 = vmatprep.subr.mxu0 %v3780_v54 }
 0x9c4   :  { %3627 = vmatmul.mubr.msk.bf16.vlgmr.msra.gmra.mxu0 %vm383_vm3, %v3210_v49  ;;  %3639 = vmatmul.mubr.msk.bf16.vlgmr.msra.gmra.mxu1 %vm383_vm3, %v3213_v50  ;;  %v2358_v50 = vpop.permute.xlu0 %2357 }
 0x9c5   :  { %3644 = vmatprep.mubr.msk.f32.mxu0 %vm3781_vm2, %v3780_v54  ;;  %3649 = vmatprep.mubr.msk.bf16.mxu1 %vm46_vm0, %v3758_v51 }
 0xa84   :  { %v2194_v53 = vpop.f32.mrf.mxu0  ;;  %v2246_v56 = vpop.f32.mrf.mxu1 }
 0xa85   :  { %v2195_v57 = vadd.f32 %v2194_v53, %v2155_v52  ;;  %v2247_v10 = vadd.f32 %v2246_v56, %v2207_v9 }
 0xa86   :  { %v3628_v58 = vpop.f32.mrf.mxu0  ;;  %v3640_v59 = vpop.f32.mrf.mxu1 }
 0xa87   :  { %v2252_v60 = vmul.f32 1.442695, %v2195_v57  ;;  %v2256_v61 = vsel %vm46_vm0, %v2195_v57, 0.0 }
 0xa88   :  { %v2257_v62 = vrot.slane %v2256_v61, 4  ;;  %v2197_v63 = vpop.f32.mrf.mxu0  ;;  %v2249_v0 = vpop.f32.mrf.mxu1 }
 0xa89   :  { %3774 = vpow2.f32 %v2252_v60 }
 0xa8a   :  { %v2258_v1 = vadd.f32 %v2257_v62, %v2256_v61  ;;  %v3629_v2 = vpop.f32.mrf.mxu0  ;;  %v3641_v3 = vpop.f32.mrf.mxu1 }
 0xa8b   :  { %v3763_v3 = vld [vmem:[%s4542_s4 + $0x68] sm:$0xff]  }
 0xa8c   :  { %v2259_v4 = vrot.slane %v2258_v1, 2 }
 0xa8e   :  { %v2260_v5 = vadd.f32 %v2259_v4, %v2258_v1  ;;  %v3764_v4 = vld [vmem:[%s4542_s4 + $0x70] sm:$0xff]  }
 0xa90   :  { %v2261_v6 = vrot.slane %v2260_v5, 1 }
 0xa92   :  { %v2262_v7 = vadd.f32 %v2261_v6, %v2260_v5  ;;  %v3765_v5 = vld [vmem:[%s4542_s4 + $0x78] sm:$0xff]   ;;  %v3766_v6 = vld [vmem:[%s4543_s6 + $0x60] sm:$0xff]  }
 0xa94   :  { %v4445_v8 = vadd.f32 %v2262_v7, %v4354_v16  ;;  %v2579_v7 = vpop.permute.xlu1 %2578 }
 0xa96   :  { %v3775_v13 = vpop.eup %3774 }
 0xa97   :  { %v2254_v11 = vmul.f32 %v3775_v13, %v4386_v28  ;;  %v3760_v28 = vld [vmem:[%s4535_s2 + $0x70] sm:$0xff]   ;;  %v2574_v13 = vpop.permute.xlu0 %2573 }
 0xa99   :  { %v2255_v12 = vadd.f32 %v2254_v11, %v2247_v10  ;;  %v2569_v11 = vpop.permute.xlu1 %2568 }
 0xa9b   :  { %3216 = vst.msk [vmem:[%s4536_s12 + $0x18] sm:$0xff] %vm46_vm0, %v2255_v12  ;;  %v2345_v14 = vpack.c.bf16 %v2255_v12, %v2255_v12  ;;  %3643 = vmatpush3.msra.mxu0 %v2255_v12 }
 0xa9c   :  { %3645 = vmatmul.mubr.msk.f32.vlgmr.msra.gmra.mxu0 %vm46_vm0, %v4364_v23  ;;  %v3761_v23 = vld [vmem:[%s4535_s2 + $0x78] sm:$0xff]  }
 0xa9d   :  { %3716 = vmatprep.subr.msk.bf16.mxu1 %vm210_vm1, %v2345_v14  ;;  %v2428_v16 = vsel %vm210_vm1, %v2345_v14, 0  ;;  %3665 = vmatprep.mubr.msk.bf16.mxu0 %vm383_vm3, %v3762_v17  ;;  %v2564_v14 = vpop.permute.xlu0 %2563 }
 0xa9e   :  { %3648 = vmatpush3.bf16.msra.mxu1 %v2428_v16 }
 0xaa1   :  { %3650 = vmatmul.mubr.msk.bf16.vlgmr.msra.gmra.mxu1 %vm46_vm0, %v3759_v15 }
 0xaa2   :  { %3653 = vmatprep.mubr.msk.bf16.mxu1 %vm46_vm0, %v3760_v28  ;;  %v2559_v28 = vpop.permute.xlu1 %2558 }
 0xaa9   :  { %3654 = vmatmul.mubr.msk.bf16.gmra.mxu1 %vm46_vm0, %v3761_v23 }
 0xaaa   :  { %3681 = vmatprep.mubr.msk.bf16.mxu1 %vm383_vm3, %v3766_v6 }
 0xb5c   :  { %v4472_v18 = vpop.f32.mrf.mxu0 }
 0xb5e   :  { %v3646_v20 = vpop.f32.mrf.mxu0 }
 0xb5f   :  { %v2554_v20 = vpop.permute.xlu0 %2553 }
 0xb61   :  { %v3651_v22 = vpop.f32.mrf.mxu1 }
 0xb62   :  { %v2473_v39 = vadd.f32 %v3651_v22, %v2368_v33 }
 0xb63   :  { %v2464_v30 = vpop.f32.mrf.mxu1 }
 0xb64   :  { %v2505_v52 = vmul.f32 0.2, %v2473_v39  ;;  %v2465_v53 = vadd.f32 %v2464_v30, %v2358_v50  ;;  %vm2497_vm8 = vcmp.gt.f32.partialorder %v2473_v39, 0.0 }
 0xb65   :  { %v3652_v25 = vpop.f32.mrf.mxu1 }
 0xb66   :  { %v2476_v34 = vadd.f32 %v3652_v25, %v2373_v55  ;;  %v2503_v61 = vmul.f32 0.2, %v2465_v53  ;;  %v2513_v62 = vsel %vm2497_vm8, %v2473_v39, %v2505_v52  ;;  %vm2495_vm10 = vcmp.gt.f32.partialorder %v2465_v53, 0.0  ;;  %v3767_v52 = vld [vmem:[%s4543_s6 + $0x68] sm:$0xff]  }
 0xb67   :  { %v2467_v27 = vpop.f32.mrf.mxu1 }
 0xb68   :  { %v2506_v45 = vmul.f32 0.2, %v2476_v34  ;;  %v2468_v46 = vadd.f32 %v2467_v27, %v2363_v41  ;;  %vm2498_vm7 = vcmp.gt.f32.partialorder %v2476_v34, 0.0  ;;  %v2511_v1 = vsel %vm2495_vm10, %v2465_v53, %v2503_v61  ;;  %v2549_v27 = vpop.permute.xlu1 %2548  ;;  %v3768_v53 = vld [vmem:[%s4543_s6 + $0x70] sm:$0xff]  }
 0xb69   :  { %v3655_v36 = vpop.f32.mrf.mxu1 }
 0xb6a   :  { %v2489_v29 = vadd.f32 %v3655_v36, %v2388_v21  ;;  %v2504_v59 = vmul.f32 0.2, %v2468_v46  ;;  %v2514_v60 = vsel %vm2498_vm7, %v2476_v34, %v2506_v45  ;;  %vm2496_vm9 = vcmp.gt.f32.partialorder %v2468_v46, 0.0 }
 0xb6b   :  { %v2480_v31 = vpop.f32.mrf.mxu1  ;;  %v2529_v63 = vpack.c.bf16 %v2514_v60, %v2513_v62 }
 0xb6c   :  { %v2481_v32 = vadd.f32 %v2480_v31, %v2378_v26  ;;  %v2509_v37 = vmul.f32 0.2, %v2489_v29  ;;  %vm2501_vm1 = vcmp.gt.f32.partialorder %v2489_v29, 0.0  ;;  %v2512_v0 = vsel %vm2496_vm9, %v2468_v46, %v2504_v59 }
 0xb6d   :  { %v3656_v35 = vpop.f32.mrf.mxu1  ;;  %v2528_v2 = vpack.c.bf16 %v2512_v0, %v2511_v1 }
 0xb6e   :  { %v2492_v38 = vadd.f32 %v3656_v35, %v2393_v19  ;;  %v2507_v42 = vmul.f32 0.2, %v2481_v32  ;;  %vm2499_vm5 = vcmp.gt.f32.partialorder %v2481_v32, 0.0  ;;  %v2517_v48 = vsel %vm2501_vm1, %v2489_v29, %v2509_v37  ;;  %v2544_v37 = vpop.permute.xlu0 %2543 }
 0xb6f   :  { %v2483_v40 = vpop.f32.mrf.mxu1 }
 0xb70   :  { %vm2502_vm4 = vcmp.gt.f32.partialorder %v2492_v38, 0.0  ;;  %v2510_v43 = vmul.f32 0.2, %v2492_v38  ;;  %v2484_v44 = vadd.f32 %v2483_v40, %v2383_v24  ;;  %v2515_v56 = vsel %vm2499_vm5, %v2481_v32, %v2507_v42 }
 0xb72   :  { %vm2500_vm6 = vcmp.gt.f32.partialorder %v2484_v44, 0.0  ;;  %v2508_v47 = vmul.f32 0.2, %v2484_v44  ;;  %v2518_v49 = vsel %vm2502_vm4, %v2492_v38, %v2510_v43  ;;  %v2757_v59 = vpop.permute.xlu0 %2756 }
 0xb73   :  { %v2531_v51 = vpack.c.bf16 %v2518_v49, %v2517_v48 }
 0xb74   :  { %v2516_v57 = vsel %vm2500_vm6, %v2484_v44, %v2508_v47 }
 0xb75   :  { %3657 = vmatprep.subr.bf16.mxu0 %v2531_v51  ;;  %v2530_v58 = vpack.c.bf16 %v2516_v57, %v2515_v56  ;;  %v3769_v56 = vld [vmem:[%s4543_s6 + $0x78] sm:$0xff]   ;;  %v2762_v57 = vpop.permute.xlu1 %2761 }
 0xb76   :  { %3658 = vmatpush3.bf16.msra.mxu0 %v2531_v51  ;;  %v2747_v0 = vpop.permute.xlu0 %2746 }
 0xb77   :  { %3659 = vmatprep.subr.bf16.mxu0 %v2530_v58 }
 0xb79   :  { %v2752_v62 = vpop.permute.xlu1 %2751 }
 0xb7a   :  { %3660 = vmatpush3.bf16.msra.mxu0 %v2530_v58 }
 0xb7b   :  { %3661 = vmatprep.subr.bf16.mxu0 %v2529_v63 }
 0xb7e   :  { %3662 = vmatpush3.bf16.msra.mxu0 %v2529_v63 }
 0xb7f   :  { %3663 = vmatprep.subr.bf16.mxu0 %v2528_v2 }
 0xb82   :  { %3664 = vmatpush3.bf16.msra.mxu0 %v2528_v2 }
 0xb83   :  { %3689 = vmatprep.subr.bf16.mxu0 %v3780_v54 }
 0xb85   :  { %3666 = vmatmul.mubr.msk.bf16.vlgmr.msra.gmra.mxu0 %vm383_vm3, %v3763_v3 }
 0xb86   :  { %3669 = vmatprep.mubr.msk.bf16.mxu0 %vm383_vm3, %v3764_v4  ;;  %v2742_v4 = vpop.permute.xlu1 %2741 }
 0xb8d   :  { %3670 = vmatmul.mubr.msk.bf16.gmra.mxu0 %vm383_vm3, %v3765_v5 }
 0xb8e   :  { %3697 = vmatprep.mubr.msk.bf16.mxu0 %vm3781_vm2, %v3780_v54 }
 0xc45   :  { %v3667_v9 = vpop.f32.mrf.mxu0 }
 0xc46   :  { %v2656_v25 = vadd.f32 %v3667_v9, %v2554_v20  ;;  %v2737_v9 = vpop.permute.xlu0 %2736 }
 0xc47   :  { %v2647_v10 = vpop.f32.mrf.mxu0 }
 0xc48   :  { %v2688_v39 = vmul.f32 0.2, %v2656_v25  ;;  %v2648_v40 = vadd.f32 %v2647_v10, %v2544_v37  ;;  %vm2680_vm1 = vcmp.gt.f32.partialorder %v2656_v25, 0.0 }
 0xc49   :  { %v3668_v12 = vpop.f32.mrf.mxu0 }
 0xc4a   :  { %v2659_v21 = vadd.f32 %v3668_v12, %v2559_v28  ;;  %v2686_v46 = vmul.f32 0.2, %v2648_v40  ;;  %v2696_v47 = vsel %vm2680_vm1, %v2656_v25, %v2688_v39  ;;  %vm2678_vm5 = vcmp.gt.f32.partialorder %v2648_v40, 0.0  ;;  %v3293_v39 = vld [vmem:[%s4545_s10 + $0xc] sm:$0xf] }
 0xc4b   :  { %v2650_v16 = vpop.f32.mrf.mxu0 }
 0xc4c   :  { %v2689_v31 = vmul.f32 0.2, %v2659_v21  ;;  %v2651_v32 = vadd.f32 %v2650_v16, %v2549_v27  ;;  %vm2681_vm15 = vcmp.gt.f32.partialorder %v2659_v21, 0.0  ;;  %v2694_v50 = vsel %vm2678_vm5, %v2648_v40, %v2686_v46 }
 0xc4d   :  { %v3671_v15 = vpop.f32.mrf.mxu0 }
 0xc4e   :  { %v2672_v23 = vadd.f32 %v3671_v15, %v2574_v13  ;;  %v2687_v44 = vmul.f32 0.2, %v2651_v32  ;;  %v2697_v45 = vsel %vm2681_vm15, %v2659_v21, %v2689_v31  ;;  %vm2679_vm4 = vcmp.gt.f32.partialorder %v2651_v32, 0.0 }
 0xc4f   :  { %v2663_v17 = vpop.f32.mrf.mxu0  ;;  %v2712_v48 = vpack.c.bf16 %v2697_v45, %v2696_v47 }
 0xc50   :  { %v2664_v19 = vadd.f32 %v2663_v17, %v2564_v14  ;;  %v2692_v30 = vmul.f32 0.2, %v2672_v23  ;;  %vm2684_vm11 = vcmp.gt.f32.partialorder %v2672_v23, 0.0  ;;  %v2695_v49 = vsel %vm2679_vm4, %v2651_v32, %v2687_v44 }
 0xc51   :  { %v3672_v22 = vpop.f32.mrf.mxu0  ;;  %v2711_v51 = vpack.c.bf16 %v2695_v49, %v2694_v50 }
 0xc52   :  { %v2675_v24 = vadd.f32 %v3672_v22, %v2579_v7  ;;  %v2690_v36 = vmul.f32 0.2, %v2664_v19  ;;  %vm2682_vm13 = vcmp.gt.f32.partialorder %v2664_v19, 0.0  ;;  %v2700_v34 = vsel %vm2684_vm11, %v2672_v23, %v2692_v30 }
 0xc53   :  { %v2666_v26 = vpop.f32.mrf.mxu0 }
 0xc54   :  { %vm2685_vm12 = vcmp.gt.f32.partialorder %v2675_v24, 0.0  ;;  %v2693_v55 = vmul.f32 0.2, %v2675_v24  ;;  %v2667_v29 = vadd.f32 %v2666_v26, %v2569_v11  ;;  %v2698_v41 = vsel %vm2682_vm13, %v2664_v19, %v2690_v36  ;;  %v2732_v19 = vpop.permute.xlu1 %2731 }
 0xc55   :  { %vm3019_vm13 = vcmask 58368  }
 0xc56   :  { %vm2683_vm14 = vcmp.gt.f32.partialorder %v2667_v29, 0.0  ;;  %v2691_v33 = vmul.f32 0.2, %v2667_v29  ;;  %v2701_v35 = vsel %vm2685_vm12, %v2675_v24, %v2693_v55  ;;  %v2727_v24 = vpop.permute.xlu0 %2726 }
 0xc57   :  { %v2714_v38 = vpack.c.bf16 %v2701_v35, %v2700_v34 }
 0xc58   :  { %v2699_v42 = vsel %vm2683_vm14, %v2667_v29, %v2691_v33 }
 0xc59   :  { %3673 = vmatprep.subr.bf16.mxu1 %v2714_v38  ;;  %v2713_v43 = vpack.c.bf16 %v2699_v42, %v2698_v41 }
 0xc5a   :  { %3674 = vmatpush3.bf16.msra.mxu1 %v2714_v38  ;;  %v3290_v38 = vld [vmem:[%s4544_s8 + $0xc] sm:$0xf]  ;;  %v2896_v40 = vpop.permute.xlu0 %2895 }
 0xc5b   :  { %3675 = vmatprep.subr.bf16.mxu1 %v2713_v43 }
 0xc5e   :  { %3676 = vmatpush3.bf16.msra.mxu1 %v2713_v43 }
 0xc5f   :  { %3677 = vmatprep.subr.bf16.mxu1 %v2712_v48 }
 0xc62   :  { %3678 = vmatpush3.bf16.msra.mxu1 %v2712_v48 }
 0xc63   :  { %3679 = vmatprep.subr.bf16.mxu1 %v2711_v51 }
 0xc66   :  { %3680 = vmatpush3.bf16.msra.mxu1 %v2711_v51 }
 0xc67   :  { %3701 = vmatprep.subr.bf16.mxu1 %v3780_v54 }
 0xc69   :  { %3682 = vmatmul.mubr.msk.bf16.vlgmr.msra.gmra.mxu1 %vm383_vm3, %v3767_v52 }
 0xc6a   :  { %3685 = vmatprep.mubr.msk.bf16.mxu1 %vm383_vm3, %v3768_v53  ;;  %v2948_v53 = vpop.permute.xlu1 %2947 }
 0xc71   :  { %3686 = vmatmul.mubr.msk.bf16.gmra.mxu1 %vm383_vm3, %v3769_v56 }
 0xc72   :  { %3709 = vmatprep.mubr.msk.bf16.mxu1 %vm3781_vm2, %v3780_v54 }
 0xd29   :  { %v3683_v58 = vpop.f32.mrf.mxu1 }
 0xd2a   :  { %v2839_v16 = vadd.f32 %v3683_v58, %v2737_v9 }
 0xd2b   :  { %v2830_v60 = vpop.f32.mrf.mxu1 }
 0xd2c   :  { %v2871_v25 = vmul.f32 0.2, %v2839_v16  ;;  %v2831_v26 = vadd.f32 %v2830_v60, %v2727_v24  ;;  %vm2863_vm10 = vcmp.gt.f32.partialorder %v2839_v16, 0.0 }
 0xd2d   :  { %v3684_v61 = vpop.f32.mrf.mxu1 }
 0xd2e   :  { %v2842_v11 = vadd.f32 %v3684_v61, %v2742_v4  ;;  %v2879_v31 = vsel %vm2863_vm10, %v2839_v16, %v2871_v25  ;;  %v2869_v32 = vmul.f32 0.2, %v2831_v26  ;;  %vm2861_vm12 = vcmp.gt.f32.partialorder %v2831_v26, 0.0 }
 0xd2f   :  { %v2833_v63 = vpop.f32.mrf.mxu1 }
 0xd30   :  { %v2872_v21 = vmul.f32 0.2, %v2842_v11  ;;  %v2834_v22 = vadd.f32 %v2833_v63, %v2732_v19  ;;  %vm2864_vm9 = vcmp.gt.f32.partialorder %v2842_v11, 0.0  ;;  %v2877_v35 = vsel %vm2861_vm12, %v2831_v26, %v2869_v32 }
 0xd31   :  { %v3687_v1 = vpop.f32.mrf.mxu1 }
 0xd32   :  { %v2855_v2 = vadd.f32 %v3687_v1, %v2757_v59  ;;  %v2880_v55 = vsel %vm2864_vm9, %v2842_v11, %v2872_v21  ;;  %v2870_v29 = vmul.f32 0.2, %v2834_v22  ;;  %vm2862_vm11 = vcmp.gt.f32.partialorder %v2834_v22, 0.0 }
 0xd33   :  { %v2846_v3 = vpop.f32.mrf.mxu1  ;;  %v2886_v33 = vpack.c.bf16 %v2880_v55, %v2879_v31 }
 0xd34   :  { %v2875_v5 = vmul.f32 0.2, %v2855_v2  ;;  %vm2867_vm6 = vcmp.gt.f32.partialorder %v2855_v2, 0.0  ;;  %v2847_v7 = vadd.f32 %v2846_v3, %v2747_v0  ;;  %v2878_v34 = vsel %vm2862_vm11, %v2834_v22, %v2870_v29 }
 0xd35   :  { %v3688_v6 = vpop.f32.mrf.mxu1  ;;  %v2885_v37 = vpack.c.bf16 %v2878_v34, %v2877_v35 }
 0xd36   :  { %v2858_v13 = vadd.f32 %v3688_v6, %v2762_v57  ;;  %v2883_v15 = vsel %vm2867_vm6, %v2855_v2, %v2875_v5  ;;  %v2873_v28 = vmul.f32 0.2, %v2847_v7  ;;  %vm2865_vm8 = vcmp.gt.f32.partialorder %v2847_v7, 0.0 }
 0xd37   :  { %v2849_v10 = vpop.f32.mrf.mxu1 }
 0xd38   :  { %vm2868_vm2 = vcmp.gt.f32.partialorder %v2858_v13, 0.0  ;;  %v2876_v12 = vmul.f32 0.2, %v2858_v13  ;;  %v2850_v14 = vadd.f32 %v2849_v10, %v2752_v62  ;;  %v2881_v27 = vsel %vm2865_vm8, %v2847_v7, %v2873_v28 }
 0xd3a   :  { %v2884_v23 = vsel %vm2868_vm2, %v2858_v13, %v2876_v12  ;;  %vm2866_vm7 = vcmp.gt.f32.partialorder %v2850_v14, 0.0  ;;  %v2874_v17 = vmul.f32 0.2, %v2850_v14 }
 0xd3b   :  { %v2888_v20 = vpack.c.bf16 %v2884_v23, %v2883_v15 }
 0xd3c   :  { %v2882_v30 = vsel %vm2866_vm7, %v2850_v14, %v2874_v17 }
 0xd3d   :  { %3690 = vmatpush3.bf16.msra.mxu0 %v2888_v20  ;;  %3702 = vmatpush3.bf16.msra.mxu1 %v2888_v20  ;;  %v2887_v36 = vpack.c.bf16 %v2882_v30, %v2881_v27 }
 0xd3e   :  { %3691 = vmatprep.subr.bf16.mxu0 %v3780_v54  ;;  %3703 = vmatprep.subr.bf16.mxu1 %v3780_v54 }
 0xd41   :  { %3692 = vmatpush3.bf16.msra.mxu0 %v2887_v36  ;;  %3704 = vmatpush3.bf16.msra.mxu1 %v2887_v36 }
 0xd42   :  { %3693 = vmatprep.subr.bf16.mxu0 %v3780_v54  ;;  %3705 = vmatprep.subr.bf16.mxu1 %v3780_v54 }
 0xd45   :  { %3694 = vmatpush3.bf16.msra.mxu0 %v2886_v33  ;;  %3706 = vmatpush3.bf16.msra.mxu1 %v2886_v33 }
 0xd46   :  { %3695 = vmatprep.subr.bf16.mxu0 %v3780_v54  ;;  %3707 = vmatprep.subr.bf16.mxu1 %v3780_v54 }
 0xd49   :  { %3696 = vmatpush3.bf16.msra.mxu0 %v2885_v37  ;;  %3708 = vmatpush3.bf16.msra.mxu1 %v2885_v37 }
 0xd4c   :  { %3698 = vmatmul.mubr.msk.bf16.vlgmr.msra.gmra.mxu0 %vm383_vm3, %v3290_v38  ;;  %3710 = vmatmul.mubr.msk.bf16.vlgmr.msra.gmra.mxu1 %vm383_vm3, %v3293_v39  ;;  %vm3017_vm3 = vcmask 1040384  }
 0xe0c   :  { %v2935_v41 = vpop.f32.mrf.mxu0  ;;  %v2987_v42 = vpop.f32.mrf.mxu1 }
 0xe0d   :  { %v2936_v43 = vadd.f32 %v2935_v41, %v2896_v40  ;;  %v2988_v56 = vadd.f32 %v2987_v42, %v2948_v53 }
 0xe0e   :  { %v3699_v54 = vpop.f32.mrf.mxu0  ;;  %v3711_v44 = vpop.f32.mrf.mxu1 }
 0xe0f   :  { %v2993_v45 = vmul.f32 1.442695, %v2936_v43  ;;  %v2997_v50 = vsel %vm46_vm0, %v2936_v43, 0.0 }
 0xe10   :  { %v2938_v46 = vpop.f32.mrf.mxu0  ;;  %v2990_v47 = vpop.f32.mrf.mxu1  ;;  %v2998_v51 = vrot.slane %v2997_v50, 4 }
 0xe11   :  { %3776 = vpow2.f32 %v2993_v45 }
 0xe12   :  { %v3700_v48 = vpop.f32.mrf.mxu0  ;;  %v3712_v49 = vpop.f32.mrf.mxu1  ;;  %v2999_v58 = vadd.f32 %v2998_v51, %v2997_v50 }
 0xe14   :  { %v3000_v61 = vrot.slane %v2999_v58, 2 }
 0xe16   :  { %v3001_v0 = vadd.f32 %v3000_v61, %v2999_v58 }
 0xe18   :  { %v3002_v3 = vrot.slane %v3001_v0, 1 }
 0xe1a   :  { %v3003_v6 = vadd.f32 %v3002_v3, %v3001_v0 }
 0xe1c   :  { %v3004_v13 = vadd.f32 %v3003_v6, %v4445_v8 }
 0xe1e   :  { %v3777_v52 = vpop.eup %3776 }
 0xe1f   :  { %v2995_v57 = vmul.f32 %v3777_v52, %v4472_v18 }
 0xe21   :  { %v2996_v59 = vadd.f32 %v2995_v57, %v2988_v56 }
 0xe23   :  { %3296 = vst.msk [vmem:[%s4536_s12 + $0x20] sm:$0xff] %vm46_vm0, %v2996_v59  ;;  %v3007_v60 = vmul.f32 %v2996_v59, %v2996_v59 }
 0xe25   :  { %v3008_v62 = vsel %vm46_vm0, %v3007_v60, 0.0 }
 0xe26   :  { %v3009_v63 = vrot.slane %v3008_v62, 4 }
 0xe28   :  { %v3010_v1 = vadd.f32 %v3009_v63, %v3008_v62 }
 0xe2a   :  { %v3011_v2 = vrot.slane %v3010_v1, 2 }
 0xe2c   :  { %v3012_v4 = vadd.f32 %v3011_v2, %v3010_v1 }
 0xe2e   :  { %v3013_v5 = vrot.slane %v3012_v4, 1 }
 0xe30   :  { %v3014_v18 = vadd.f32 %v3013_v5, %v3012_v4 }
 0xe32   :  { %v3015_v7 = vmul.f32 0.5, %v3014_v18 }
 0xe34   :  { %v3016_v9 = vsub.f32 -7.351508, %v3015_v7 }
 0xe36   :  { %v3018_v10 = vsel %vm3017_vm3, %v3004_v13, %v3016_v9 }
 0xe37   :  { %3020 = vst.msk [vmem:[%s4546_s13] sm:$0x3] %vm3019_vm13, %v3018_v10 }

</bundles_post_ra>
